<compile_context>
chip_gen: v7x
topology: tpu7x:2x2x1
jax: 0.10.0
libtpu: 0.0.40
codegen_flags: <defaults>
</compile_context>

<pallas_src>
import functools

import jax
import jax.numpy as jnp
from jax.experimental import pallas as pl
from jax.experimental.pallas import tpu as pltpu

# ---- model hyper-parameters (small, consistent with the module) ----
BATCH = 2
SEQ = 8
INPUT_SIZE = 16        # features.shape[1]
HIDDEN = 32            # hidden_size (128 in the original; kept small here)
NUM_LAYERS = 3
OUTPUT_SIZE = 3
OUT_PAD = 128          # fc output padded to a full lane tile for an unmasked store


def _lstm_kernel(H, T,
                 x_ref,
                 wih0, whh0, b0,
                 wih1, whh1, b1,
                 wih2, whh2, b2,
                 wfc, bfc,
                 out_ref):
    """Stacked 3-layer LSTM over the full sequence + final Linear.

    x_ref  : (T*B, D)      time-major input, flattened rows (t*B + b); B padded to 8k
    wih*   : (in_l, 4H)    input->gates weight (pre-transposed)
    whh*   : (H, 4H)       hidden->gates weight (pre-transposed)
    b*     : (1, 4H)       combined bias (b_ih + b_hh)
    wfc    : (H, OUT_PAD)  fc weight, zero-padded to 128 lanes
    bfc    : (1, OUT_PAD)  fc bias, zero-padded to 128 lanes
    out_ref: (B, OUT_PAD)  lane-dense output slab (real logits in [:, :O])
    """
    B = x_ref.shape[0] // T

    def run_layer(x_seq, wih_ref, whh_ref, b_ref, collect_seq):
        # One batched MXU contraction for the whole sequence; bias folded in.
        gx = (jnp.dot(x_seq, wih_ref[...],
                      preferred_element_type=jnp.float32)
              + b_ref[...])                            # (T*B, 4H)

        whh = whh_ref[...]                             # hoist loop-invariant read

        h = jnp.zeros((B, H), jnp.float32)
        c = jnp.zeros((B, H), jnp.float32)
        hs = []

        # T is small & static: fully unrolled straight-line recurrence with
        # static, sublane-aligned row slices of gx.
        for t in range(T):
            g = gx[t * B:(t + 1) * B, :] + jnp.dot(
                h, whh, preferred_element_type=jnp.float32)      # (B, 4H)
            # Two full-width (B, 4H=128) EUP activations instead of four sliced ones.
            sg = jax.nn.sigmoid(g)
            tg = jnp.tanh(g)
            # PyTorch gate order: i, f, g, o
            i = sg[:, 0 * H:1 * H]
            f = sg[:, 1 * H:2 * H]
            gg = tg[:, 2 * H:3 * H]
            o = sg[:, 3 * H:4 * H]
            c = f * c + i * gg
            h = o * jnp.tanh(c)
            if collect_seq:
                hs.append(h)

        seq = jnp.concatenate(hs, axis=0) if collect_seq else None  # (T*B, H)
        return seq, h

    # layer 0 consumes x; layers 1/2 consume the previous layer's h sequence
    # (carried as vreg values, no VMEM scratch round-trip).
    seq0, _ = run_layer(x_ref[...], wih0, whh0, b0, collect_seq=True)
    seq1, _ = run_layer(seq0, wih1, whh1, b1, collect_seq=True)
    _, h_last = run_layer(seq1, wih2, whh2, b2, collect_seq=False)

    # fc on the last timestep of the top layer: out = h_T @ W_fc^T + b_fc
    # wfc/bfc are lane-padded, so this is a single unmasked (B, 128) store.
    out_ref[...] = (jnp.dot(h_last, wfc[...],
                            preferred_element_type=jnp.float32)
                    + bfc[...]).astype(out_ref.dtype)


def init_params(key, input_size, hidden_size, num_layers, output_size):
    """Deterministic init matching the PyTorch parameter shapes
    (U(-1/sqrt(H), 1/sqrt(H)), same as torch default for LSTM/Linear)."""
    k = 1.0 / jnp.sqrt(jnp.float32(hidden_size))
    params = {}
    keys = jax.random.split(key, num_layers * 4 + 2)
    idx = 0
    for l in range(num_layers):
        in_l = input_size if l == 0 else hidden_size
        params[f"w_ih{l}"] = jax.random.uniform(
            keys[idx], (4 * hidden_size, in_l), jnp.float32, -k, k); idx += 1
        params[f"w_hh{l}"] = jax.random.uniform(
            keys[idx], (4 * hidden_size, hidden_size), jnp.float32, -k, k); idx += 1
        params[f"b_ih{l}"] = jax.random.uniform(
            keys[idx], (4 * hidden_size,), jnp.float32, -k, k); idx += 1
        params[f"b_hh{l}"] = jax.random.uniform(
            keys[idx], (4 * hidden_size,), jnp.float32, -k, k); idx += 1
    kf = 1.0 / jnp.sqrt(jnp.float32(hidden_size))
    params["w_fc"] = jax.random.uniform(
        keys[idx], (output_size, hidden_size), jnp.float32, -kf, kf); idx += 1
    params["b_fc"] = jax.random.uniform(
        keys[idx], (output_size,), jnp.float32, -kf, kf)
    return params


def prepare_params(params, num_layers, hidden_size, out_pad=OUT_PAD):
    """One-time weight prep (outside the jitted forward): transpose so every
    in-kernel matmul is a plain (rows, K) @ (K, N), pre-combine biases, and
    zero-pad the fc projection to a full 128-lane output tile."""
    prepped = []
    for l in range(num_layers):
        prepped.append(jnp.asarray(params[f"w_ih{l}"]).T)             # (in_l, 4H)
        prepped.append(jnp.asarray(params[f"w_hh{l}"]).T)             # (H, 4H)
        prepped.append((params[f"b_ih{l}"] + params[f"b_hh{l}"])
                       .reshape(1, 4 * hidden_size))                  # (1, 4H)
    w_fc_t = jnp.asarray(params["w_fc"]).T                            # (H, O)
    b_fc = jnp.asarray(params["b_fc"]).reshape(1, -1)                 # (1, O)
    o = w_fc_t.shape[1]
    prepped.append(jnp.pad(w_fc_t, ((0, 0), (0, out_pad - o))))       # (H, 128)
    prepped.append(jnp.pad(b_fc, ((0, 0), (0, out_pad - o))))         # (1, 128)
    return tuple(prepped)


@functools.partial(jax.jit, static_argnames=("out_size",))
def lstm_classification_forward(x, prepped, out_size):
    """x: (B, T, D) batch-first, float32 -> (B, out_size)."""
    B, T, D = x.shape
    H = prepped[1].shape[0]          # whh0^T is (H, 4H)
    O_pad = prepped[-1].shape[1]

    # Pad batch to a multiple of 8: fills f32 sublanes / MXU row groups and
    # keeps all (T*B, .) row slices sublane-tile aligned. Padded rows are
    # computed (finite, zero input) and sliced off at the end.
    B_pad = max(8, ((B + 7) // 8) * 8)
    x_tm = jnp.transpose(x, (1, 0, 2))                   # (T, B, D) time-major
    if B_pad != B:
        x_tm = jnp.pad(x_tm, ((0, 0), (0, B_pad - B), (0, 0)))
    x_2d = x_tm.reshape(T * B_pad, D)                    # rows ordered t*B + b

    kernel = functools.partial(_lstm_kernel, H, T)

    out = pl.pallas_call(
        kernel,
        out_shape=jax.ShapeDtypeStruct((B_pad, O_pad), jnp.float32),
        in_specs=[pl.BlockSpec(memory_space=pltpu.MemorySpace.VMEM)]
                 * (1 + len(prepped)),
        out_specs=pl.BlockSpec(memory_space=pltpu.MemorySpace.VMEM),
    )(x_2d, *prepped)
    # TODO(synk): for a v7x deployment with large real batches, add a leading
    # grid axis over batch with dimension_semantics=("parallel",) to use both
    # TensorCores; pointless at B=2.
    return out[:B, :out_size]


def reference_forward(x, params):
    """Pure-JAX reference mirroring nn.LSTM + nn.Linear semantics."""
    B, T, D = x.shape
    H = params["w_hh0"].shape[1]
    layer_in = x
    for l in range(NUM_LAYERS):
        w_ih, w_hh = params[f"w_ih{l}"], params[f"w_hh{l}"]
        b_ih, b_hh = params[f"b_ih{l}"], params[f"b_hh{l}"]
        h = jnp.zeros((B, H), jnp.float32)
        c = jnp.zeros((B, H), jnp.float32)
        seq = []
        for t in range(T):
            g = layer_in[:, t, :] @ w_ih.T + b_ih + h @ w_hh.T + b_hh
            i = jax.nn.sigmoid(g[:, 0 * H:1 * H])
            f = jax.nn.sigmoid(g[:, 1 * H:2 * H])
            gg = jnp.tanh(g[:, 2 * H:3 * H])
            o = jax.nn.sigmoid(g[:, 3 * H:4 * H])
            c = f * c + i * gg
            h = o * jnp.tanh(c)
            seq.append(h)
        layer_in = jnp.stack(seq, axis=1)
    return layer_in[:, -1, :] @ params["w_fc"].T + params["b_fc"]


if __name__ == "__main__":
    key = jax.random.PRNGKey(0)
    k_x, k_p = jax.random.split(key)

    x = jax.random.normal(k_x, (BATCH, SEQ, INPUT_SIZE), jnp.float32)
    params = init_params(k_p, INPUT_SIZE, HIDDEN, NUM_LAYERS, OUTPUT_SIZE)
    prepped = prepare_params(params, NUM_LAYERS, HIDDEN)

    out = lstm_classification_forward(x, prepped, OUTPUT_SIZE)
    out = jax.block_until_ready(out)

    ref = reference_forward(x, params)
    assert out.shape == (BATCH, OUTPUT_SIZE)
    assert jnp.allclose(out, ref, atol=1e-4, rtol=1e-4), (out, ref)

    print("KERNEL_OK")
</pallas_src>

<mosaic_0001>
module attributes {stable_mosaic.version = 11 : i64} {
  func.func @_lstm_kernel(%arg0: memref<64x16xf32, #tpu.memory_space<vmem>>, %arg1: memref<16x128xf32, #tpu.memory_space<vmem>>, %arg2: memref<32x128xf32, #tpu.memory_space<vmem>>, %arg3: memref<1x128xf32, #tpu.memory_space<vmem>>, %arg4: memref<32x128xf32, #tpu.memory_space<vmem>>, %arg5: memref<32x128xf32, #tpu.memory_space<vmem>>, %arg6: memref<1x128xf32, #tpu.memory_space<vmem>>, %arg7: memref<32x128xf32, #tpu.memory_space<vmem>>, %arg8: memref<32x128xf32, #tpu.memory_space<vmem>>, %arg9: memref<1x128xf32, #tpu.memory_space<vmem>>, %arg10: memref<32x128xf32, #tpu.memory_space<vmem>>, %arg11: memref<1x128xf32, #tpu.memory_space<vmem>>, %arg12: memref<8x128xf32, #tpu.memory_space<vmem>>) attributes {dimension_semantics = [], scalar_prefetch = 0 : i64, scratch_operands = 0 : i64, tpu.core_type = #tpu.core_type<tc>} {
    %c0 = arith.constant 0 : index
    %c0_0 = arith.constant 0 : index
    %0 = vector.load %arg0[%c0, %c0_0] : memref<64x16xf32, #tpu.memory_space<vmem>>, vector<64x16xf32>
    %c0_1 = arith.constant 0 : index
    %c0_2 = arith.constant 0 : index
    %1 = vector.load %arg1[%c0_1, %c0_2] : memref<16x128xf32, #tpu.memory_space<vmem>>, vector<16x128xf32>
    %cst = arith.constant dense<0.000000e+00> : vector<64x128xf32>
    %2 = tpu.matmul %0, %1, %cst {dimension_numbers = #tpu.dot_dimension_numbers<[1], [0], [0], [1], [0, 0, 1, 1], [], []>} : vector<64x16xf32>, vector<16x128xf32>, vector<64x128xf32> -> vector<64x128xf32>
    %c0_3 = arith.constant 0 : index
    %c0_4 = arith.constant 0 : index
    %3 = vector.load %arg3[%c0_3, %c0_4] : memref<1x128xf32, #tpu.memory_space<vmem>>, vector<1x128xf32>
    %4 = vector.broadcast %3 : vector<1x128xf32> to vector<64x128xf32>
    %5 = arith.addf %2, %4 : vector<64x128xf32>
    %c0_5 = arith.constant 0 : index
    %c0_6 = arith.constant 0 : index
    %6 = vector.load %arg2[%c0_5, %c0_6] : memref<32x128xf32, #tpu.memory_space<vmem>>, vector<32x128xf32>
    %cst_7 = arith.constant 0.000000e+00 : f32
    %7 = vector.broadcast %cst_7 : f32 to vector<8x32xf32>
    %cst_8 = arith.constant 0.000000e+00 : f32
    %8 = vector.broadcast %cst_8 : f32 to vector<8x32xf32>
    %9 = vector.extract_strided_slice %5 {offsets = [0, 0], sizes = [8, 128], strides = [1, 1]} : vector<64x128xf32> to vector<8x128xf32>
    %cst_9 = arith.constant dense<0.000000e+00> : vector<8x128xf32>
    %10 = tpu.matmul %7, %6, %cst_9 {dimension_numbers = #tpu.dot_dimension_numbers<[1], [0], [0], [1], [0, 0, 1, 1], [], []>} : vector<8x32xf32>, vector<32x128xf32>, vector<8x128xf32> -> vector<8x128xf32>
    %11 = arith.addf %9, %10 : vector<8x128xf32>
    %12 = arith.negf %11 : vector<8x128xf32>
    %13 = math.exp %12 : vector<8x128xf32>
    %cst_10 = arith.constant 1.000000e+00 : f32
    %14 = vector.broadcast %cst_10 : f32 to vector<8x128xf32>
    %15 = arith.addf %14, %13 : vector<8x128xf32>
    %16 = arith.divf %14, %15 : vector<8x128xf32>
    %17 = math.tanh %11 : vector<8x128xf32>
    %18 = vector.extract_strided_slice %16 {offsets = [0, 0], sizes = [8, 32], strides = [1, 1]} : vector<8x128xf32> to vector<8x32xf32>
    %19 = vector.extract_strided_slice %16 {offsets = [0, 32], sizes = [8, 32], strides = [1, 1]} : vector<8x128xf32> to vector<8x32xf32>
    %20 = vector.extract_strided_slice %17 {offsets = [0, 64], sizes = [8, 32], strides = [1, 1]} : vector<8x128xf32> to vector<8x32xf32>
    %21 = vector.extract_strided_slice %16 {offsets = [0, 96], sizes = [8, 32], strides = [1, 1]} : vector<8x128xf32> to vector<8x32xf32>
    %22 = arith.mulf %19, %8 : vector<8x32xf32>
    %23 = arith.mulf %18, %20 : vector<8x32xf32>
    %24 = arith.addf %22, %23 : vector<8x32xf32>
    %25 = math.tanh %24 : vector<8x32xf32>
    %26 = arith.mulf %21, %25 : vector<8x32xf32>
    %27 = vector.extract_strided_slice %5 {offsets = [8, 0], sizes = [8, 128], strides = [1, 1]} : vector<64x128xf32> to vector<8x128xf32>
    %cst_11 = arith.constant dense<0.000000e+00> : vector<8x128xf32>
    %28 = tpu.matmul %26, %6, %cst_11 {dimension_numbers = #tpu.dot_dimension_numbers<[1], [0], [0], [1], [0, 0, 1, 1], [], []>} : vector<8x32xf32>, vector<32x128xf32>, vector<8x128xf32> -> vector<8x128xf32>
    %29 = arith.addf %27, %28 : vector<8x128xf32>
    %30 = arith.negf %29 : vector<8x128xf32>
    %31 = math.exp %30 : vector<8x128xf32>
    %cst_12 = arith.constant 1.000000e+00 : f32
    %32 = vector.broadcast %cst_12 : f32 to vector<8x128xf32>
    %33 = arith.addf %32, %31 : vector<8x128xf32>
    %34 = arith.divf %32, %33 : vector<8x128xf32>
    %35 = math.tanh %29 : vector<8x128xf32>
    %36 = vector.extract_strided_slice %34 {offsets = [0, 0], sizes = [8, 32], strides = [1, 1]} : vector<8x128xf32> to vector<8x32xf32>
    %37 = vector.extract_strided_slice %34 {offsets = [0, 32], sizes = [8, 32], strides = [1, 1]} : vector<8x128xf32> to vector<8x32xf32>
    %38 = vector.extract_strided_slice %35 {offsets = [0, 64], sizes = [8, 32], strides = [1, 1]} : vector<8x128xf32> to vector<8x32xf32>
    %39 = vector.extract_strided_slice %34 {offsets = [0, 96], sizes = [8, 32], strides = [1, 1]} : vector<8x128xf32> to vector<8x32xf32>
    %40 = arith.mulf %37, %24 : vector<8x32xf32>
    %41 = arith.mulf %36, %38 : vector<8x32xf32>
    %42 = arith.addf %40, %41 : vector<8x32xf32>
    %43 = math.tanh %42 : vector<8x32xf32>
    %44 = arith.mulf %39, %43 : vector<8x32xf32>
    %45 = vector.extract_strided_slice %5 {offsets = [16, 0], sizes = [8, 128], strides = [1, 1]} : vector<64x128xf32> to vector<8x128xf32>
    %cst_13 = arith.constant dense<0.000000e+00> : vector<8x128xf32>
    %46 = tpu.matmul %44, %6, %cst_13 {dimension_numbers = #tpu.dot_dimension_numbers<[1], [0], [0], [1], [0, 0, 1, 1], [], []>} : vector<8x32xf32>, vector<32x128xf32>, vector<8x128xf32> -> vector<8x128xf32>
    %47 = arith.addf %45, %46 : vector<8x128xf32>
    %48 = arith.negf %47 : vector<8x128xf32>
    %49 = math.exp %48 : vector<8x128xf32>
    %cst_14 = arith.constant 1.000000e+00 : f32
    %50 = vector.broadcast %cst_14 : f32 to vector<8x128xf32>
    %51 = arith.addf %50, %49 : vector<8x128xf32>
    %52 = arith.divf %50, %51 : vector<8x128xf32>
    %53 = math.tanh %47 : vector<8x128xf32>
    %54 = vector.extract_strided_slice %52 {offsets = [0, 0], sizes = [8, 32], strides = [1, 1]} : vector<8x128xf32> to vector<8x32xf32>
    %55 = vector.extract_strided_slice %52 {offsets = [0, 32], sizes = [8, 32], strides = [1, 1]} : vector<8x128xf32> to vector<8x32xf32>
    %56 = vector.extract_strided_slice %53 {offsets = [0, 64], sizes = [8, 32], strides = [1, 1]} : vector<8x128xf32> to vector<8x32xf32>
    %57 = vector.extract_strided_slice %52 {offsets = [0, 96], sizes = [8, 32], strides = [1, 1]} : vector<8x128xf32> to vector<8x32xf32>
    %58 = arith.mulf %55, %42 : vector<8x32xf32>
    %59 = arith.mulf %54, %56 : vector<8x32xf32>
    %60 = arith.addf %58, %59 : vector<8x32xf32>
    %61 = math.tanh %60 : vector<8x32xf32>
    %62 = arith.mulf %57, %61 : vector<8x32xf32>
    %63 = vector.extract_strided_slice %5 {offsets = [24, 0], sizes = [8, 128], strides = [1, 1]} : vector<64x128xf32> to vector<8x128xf32>
    %cst_15 = arith.constant dense<0.000000e+00> : vector<8x128xf32>
    %64 = tpu.matmul %62, %6, %cst_15 {dimension_numbers = #tpu.dot_dimension_numbers<[1], [0], [0], [1], [0, 0, 1, 1], [], []>} : vector<8x32xf32>, vector<32x128xf32>, vector<8x128xf32> -> vector<8x128xf32>
    %65 = arith.addf %63, %64 : vector<8x128xf32>
    %66 = arith.negf %65 : vector<8x128xf32>
    %67 = math.exp %66 : vector<8x128xf32>
    %cst_16 = arith.constant 1.000000e+00 : f32
    %68 = vector.broadcast %cst_16 : f32 to vector<8x128xf32>
    %69 = arith.addf %68, %67 : vector<8x128xf32>
    %70 = arith.divf %68, %69 : vector<8x128xf32>
    %71 = math.tanh %65 : vector<8x128xf32>
    %72 = vector.extract_strided_slice %70 {offsets = [0, 0], sizes = [8, 32], strides = [1, 1]} : vector<8x128xf32> to vector<8x32xf32>
    %73 = vector.extract_strided_slice %70 {offsets = [0, 32], sizes = [8, 32], strides = [1, 1]} : vector<8x128xf32> to vector<8x32xf32>
    %74 = vector.extract_strided_slice %71 {offsets = [0, 64], sizes = [8, 32], strides = [1, 1]} : vector<8x128xf32> to vector<8x32xf32>
    %75 = vector.extract_strided_slice %70 {offsets = [0, 96], sizes = [8, 32], strides = [1, 1]} : vector<8x128xf32> to vector<8x32xf32>
    %76 = arith.mulf %73, %60 : vector<8x32xf32>
    %77 = arith.mulf %72, %74 : vector<8x32xf32>
    %78 = arith.addf %76, %77 : vector<8x32xf32>
    %79 = math.tanh %78 : vector<8x32xf32>
    %80 = arith.mulf %75, %79 : vector<8x32xf32>
    %81 = vector.extract_strided_slice %5 {offsets = [32, 0], sizes = [8, 128], strides = [1, 1]} : vector<64x128xf32> to vector<8x128xf32>
    %cst_17 = arith.constant dense<0.000000e+00> : vector<8x128xf32>
    %82 = tpu.matmul %80, %6, %cst_17 {dimension_numbers = #tpu.dot_dimension_numbers<[1], [0], [0], [1], [0, 0, 1, 1], [], []>} : vector<8x32xf32>, vector<32x128xf32>, vector<8x128xf32> -> vector<8x128xf32>
    %83 = arith.addf %81, %82 : vector<8x128xf32>
    %84 = arith.negf %83 : vector<8x128xf32>
    %85 = math.exp %84 : vector<8x128xf32>
    %cst_18 = arith.constant 1.000000e+00 : f32
    %86 = vector.broadcast %cst_18 : f32 to vector<8x128xf32>
    %87 = arith.addf %86, %85 : vector<8x128xf32>
    %88 = arith.divf %86, %87 : vector<8x128xf32>
    %89 = math.tanh %83 : vector<8x128xf32>
    %90 = vector.extract_strided_slice %88 {offsets = [0, 0], sizes = [8, 32], strides = [1, 1]} : vector<8x128xf32> to vector<8x32xf32>
    %91 = vector.extract_strided_slice %88 {offsets = [0, 32], sizes = [8, 32], strides = [1, 1]} : vector<8x128xf32> to vector<8x32xf32>
    %92 = vector.extract_strided_slice %89 {offsets = [0, 64], sizes = [8, 32], strides = [1, 1]} : vector<8x128xf32> to vector<8x32xf32>
    %93 = vector.extract_strided_slice %88 {offsets = [0, 96], sizes = [8, 32], strides = [1, 1]} : vector<8x128xf32> to vector<8x32xf32>
    %94 = arith.mulf %91, %78 : vector<8x32xf32>
    %95 = arith.mulf %90, %92 : vector<8x32xf32>
    %96 = arith.addf %94, %95 : vector<8x32xf32>
    %97 = math.tanh %96 : vector<8x32xf32>
    %98 = arith.mulf %93, %97 : vector<8x32xf32>
    %99 = vector.extract_strided_slice %5 {offsets = [40, 0], sizes = [8, 128], strides = [1, 1]} : vector<64x128xf32> to vector<8x128xf32>
    %cst_19 = arith.constant dense<0.000000e+00> : vector<8x128xf32>
    %100 = tpu.matmul %98, %6, %cst_19 {dimension_numbers = #tpu.dot_dimension_numbers<[1], [0], [0], [1], [0, 0, 1, 1], [], []>} : vector<8x32xf32>, vector<32x128xf32>, vector<8x128xf32> -> vector<8x128xf32>
    %101 = arith.addf %99, %100 : vector<8x128xf32>
    %102 = arith.negf %101 : vector<8x128xf32>
    %103 = math.exp %102 : vector<8x128xf32>
    %cst_20 = arith.constant 1.000000e+00 : f32
    %104 = vector.broadcast %cst_20 : f32 to vector<8x128xf32>
    %105 = arith.addf %104, %103 : vector<8x128xf32>
    %106 = arith.divf %104, %105 : vector<8x128xf32>
    %107 = math.tanh %101 : vector<8x128xf32>
    %108 = vector.extract_strided_slice %106 {offsets = [0, 0], sizes = [8, 32], strides = [1, 1]} : vector<8x128xf32> to vector<8x32xf32>
    %109 = vector.extract_strided_slice %106 {offsets = [0, 32], sizes = [8, 32], strides = [1, 1]} : vector<8x128xf32> to vector<8x32xf32>
    %110 = vector.extract_strided_slice %107 {offsets = [0, 64], sizes = [8, 32], strides = [1, 1]} : vector<8x128xf32> to vector<8x32xf32>
    %111 = vector.extract_strided_slice %106 {offsets = [0, 96], sizes = [8, 32], strides = [1, 1]} : vector<8x128xf32> to vector<8x32xf32>
    %112 = arith.mulf %109, %96 : vector<8x32xf32>
    %113 = arith.mulf %108, %110 : vector<8x32xf32>
    %114 = arith.addf %112, %113 : vector<8x32xf32>
    %115 = math.tanh %114 : vector<8x32xf32>
    %116 = arith.mulf %111, %115 : vector<8x32xf32>
    %117 = vector.extract_strided_slice %5 {offsets = [48, 0], sizes = [8, 128], strides = [1, 1]} : vector<64x128xf32> to vector<8x128xf32>
    %cst_21 = arith.constant dense<0.000000e+00> : vector<8x128xf32>
    %118 = tpu.matmul %116, %6, %cst_21 {dimension_numbers = #tpu.dot_dimension_numbers<[1], [0], [0], [1], [0, 0, 1, 1], [], []>} : vector<8x32xf32>, vector<32x128xf32>, vector<8x128xf32> -> vector<8x128xf32>
    %119 = arith.addf %117, %118 : vector<8x128xf32>
    %120 = arith.negf %119 : vector<8x128xf32>
    %121 = math.exp %120 : vector<8x128xf32>
    %cst_22 = arith.constant 1.000000e+00 : f32
    %122 = vector.broadcast %cst_22 : f32 to vector<8x128xf32>
    %123 = arith.addf %122, %121 : vector<8x128xf32>
    %124 = arith.divf %122, %123 : vector<8x128xf32>
    %125 = math.tanh %119 : vector<8x128xf32>
    %126 = vector.extract_strided_slice %124 {offsets = [0, 0], sizes = [8, 32], strides = [1, 1]} : vector<8x128xf32> to vector<8x32xf32>
    %127 = vector.extract_strided_slice %124 {offsets = [0, 32], sizes = [8, 32], strides = [1, 1]} : vector<8x128xf32> to vector<8x32xf32>
    %128 = vector.extract_strided_slice %125 {offsets = [0, 64], sizes = [8, 32], strides = [1, 1]} : vector<8x128xf32> to vector<8x32xf32>
    %129 = vector.extract_strided_slice %124 {offsets = [0, 96], sizes = [8, 32], strides = [1, 1]} : vector<8x128xf32> to vector<8x32xf32>
    %130 = arith.mulf %127, %114 : vector<8x32xf32>
    %131 = arith.mulf %126, %128 : vector<8x32xf32>
    %132 = arith.addf %130, %131 : vector<8x32xf32>
    %133 = math.tanh %132 : vector<8x32xf32>
    %134 = arith.mulf %129, %133 : vector<8x32xf32>
    %135 = vector.extract_strided_slice %5 {offsets = [56, 0], sizes = [8, 128], strides = [1, 1]} : vector<64x128xf32> to vector<8x128xf32>
    %cst_23 = arith.constant dense<0.000000e+00> : vector<8x128xf32>
    %136 = tpu.matmul %134, %6, %cst_23 {dimension_numbers = #tpu.dot_dimension_numbers<[1], [0], [0], [1], [0, 0, 1, 1], [], []>} : vector<8x32xf32>, vector<32x128xf32>, vector<8x128xf32> -> vector<8x128xf32>
    %137 = arith.addf %135, %136 : vector<8x128xf32>
    %138 = arith.negf %137 : vector<8x128xf32>
    %139 = math.exp %138 : vector<8x128xf32>
    %cst_24 = arith.constant 1.000000e+00 : f32
    %140 = vector.broadcast %cst_24 : f32 to vector<8x128xf32>
    %141 = arith.addf %140, %139 : vector<8x128xf32>
    %142 = arith.divf %140, %141 : vector<8x128xf32>
    %143 = math.tanh %137 : vector<8x128xf32>
    %144 = vector.extract_strided_slice %142 {offsets = [0, 0], sizes = [8, 32], strides = [1, 1]} : vector<8x128xf32> to vector<8x32xf32>
    %145 = vector.extract_strided_slice %142 {offsets = [0, 32], sizes = [8, 32], strides = [1, 1]} : vector<8x128xf32> to vector<8x32xf32>
    %146 = vector.extract_strided_slice %143 {offsets = [0, 64], sizes = [8, 32], strides = [1, 1]} : vector<8x128xf32> to vector<8x32xf32>
    %147 = vector.extract_strided_slice %142 {offsets = [0, 96], sizes = [8, 32], strides = [1, 1]} : vector<8x128xf32> to vector<8x32xf32>
    %148 = arith.mulf %145, %132 : vector<8x32xf32>
    %149 = arith.mulf %144, %146 : vector<8x32xf32>
    %150 = arith.addf %148, %149 : vector<8x32xf32>
    %151 = math.tanh %150 : vector<8x32xf32>
    %152 = arith.mulf %147, %151 : vector<8x32xf32>
    %153 = tpu.concatenate %26, %44, %62, %80, %98, %116, %134, %152 in 0 : vector<8x32xf32>, vector<8x32xf32>, vector<8x32xf32>, vector<8x32xf32>, vector<8x32xf32>, vector<8x32xf32>, vector<8x32xf32>, vector<8x32xf32> -> vector<64x32xf32>
    %c0_25 = arith.constant 0 : index
    %c0_26 = arith.constant 0 : index
    %154 = vector.load %arg4[%c0_25, %c0_26] : memref<32x128xf32, #tpu.memory_space<vmem>>, vector<32x128xf32>
    %cst_27 = arith.constant dense<0.000000e+00> : vector<64x128xf32>
    %155 = tpu.matmul %153, %154, %cst_27 {dimension_numbers = #tpu.dot_dimension_numbers<[1], [0], [0], [1], [0, 0, 1, 1], [], []>} : vector<64x32xf32>, vector<32x128xf32>, vector<64x128xf32> -> vector<64x128xf32>
    %c0_28 = arith.constant 0 : index
    %c0_29 = arith.constant 0 : index
    %156 = vector.load %arg6[%c0_28, %c0_29] : memref<1x128xf32, #tpu.memory_space<vmem>>, vector<1x128xf32>
    %157 = vector.broadcast %156 : vector<1x128xf32> to vector<64x128xf32>
    %158 = arith.addf %155, %157 : vector<64x128xf32>
    %c0_30 = arith.constant 0 : index
    %c0_31 = arith.constant 0 : index
    %159 = vector.load %arg5[%c0_30, %c0_31] : memref<32x128xf32, #tpu.memory_space<vmem>>, vector<32x128xf32>
    %cst_32 = arith.constant 0.000000e+00 : f32
    %160 = vector.broadcast %cst_32 : f32 to vector<8x32xf32>
    %cst_33 = arith.constant 0.000000e+00 : f32
    %161 = vector.broadcast %cst_33 : f32 to vector<8x32xf32>
    %162 = vector.extract_strided_slice %158 {offsets = [0, 0], sizes = [8, 128], strides = [1, 1]} : vector<64x128xf32> to vector<8x128xf32>
    %cst_34 = arith.constant dense<0.000000e+00> : vector<8x128xf32>
    %163 = tpu.matmul %160, %159, %cst_34 {dimension_numbers = #tpu.dot_dimension_numbers<[1], [0], [0], [1], [0, 0, 1, 1], [], []>} : vector<8x32xf32>, vector<32x128xf32>, vector<8x128xf32> -> vector<8x128xf32>
    %164 = arith.addf %162, %163 : vector<8x128xf32>
    %165 = arith.negf %164 : vector<8x128xf32>
    %166 = math.exp %165 : vector<8x128xf32>
    %cst_35 = arith.constant 1.000000e+00 : f32
    %167 = vector.broadcast %cst_35 : f32 to vector<8x128xf32>
    %168 = arith.addf %167, %166 : vector<8x128xf32>
    %169 = arith.divf %167, %168 : vector<8x128xf32>
    %170 = math.tanh %164 : vector<8x128xf32>
    %171 = vector.extract_strided_slice %169 {offsets = [0, 0], sizes = [8, 32], strides = [1, 1]} : vector<8x128xf32> to vector<8x32xf32>
    %172 = vector.extract_strided_slice %169 {offsets = [0, 32], sizes = [8, 32], strides = [1, 1]} : vector<8x128xf32> to vector<8x32xf32>
    %173 = vector.extract_strided_slice %170 {offsets = [0, 64], sizes = [8, 32], strides = [1, 1]} : vector<8x128xf32> to vector<8x32xf32>
    %174 = vector.extract_strided_slice %169 {offsets = [0, 96], sizes = [8, 32], strides = [1, 1]} : vector<8x128xf32> to vector<8x32xf32>
    %175 = arith.mulf %172, %161 : vector<8x32xf32>
    %176 = arith.mulf %171, %173 : vector<8x32xf32>
    %177 = arith.addf %175, %176 : vector<8x32xf32>
    %178 = math.tanh %177 : vector<8x32xf32>
    %179 = arith.mulf %174, %178 : vector<8x32xf32>
    %180 = vector.extract_strided_slice %158 {offsets = [8, 0], sizes = [8, 128], strides = [1, 1]} : vector<64x128xf32> to vector<8x128xf32>
    %cst_36 = arith.constant dense<0.000000e+00> : vector<8x128xf32>
    %181 = tpu.matmul %179, %159, %cst_36 {dimension_numbers = #tpu.dot_dimension_numbers<[1], [0], [0], [1], [0, 0, 1, 1], [], []>} : vector<8x32xf32>, vector<32x128xf32>, vector<8x128xf32> -> vector<8x128xf32>
    %182 = arith.addf %180, %181 : vector<8x128xf32>
    %183 = arith.negf %182 : vector<8x128xf32>
    %184 = math.exp %183 : vector<8x128xf32>
    %cst_37 = arith.constant 1.000000e+00 : f32
    %185 = vector.broadcast %cst_37 : f32 to vector<8x128xf32>
    %186 = arith.addf %185, %184 : vector<8x128xf32>
    %187 = arith.divf %185, %186 : vector<8x128xf32>
    %188 = math.tanh %182 : vector<8x128xf32>
    %189 = vector.extract_strided_slice %187 {offsets = [0, 0], sizes = [8, 32], strides = [1, 1]} : vector<8x128xf32> to vector<8x32xf32>
    %190 = vector.extract_strided_slice %187 {offsets = [0, 32], sizes = [8, 32], strides = [1, 1]} : vector<8x128xf32> to vector<8x32xf32>
    %191 = vector.extract_strided_slice %188 {offsets = [0, 64], sizes = [8, 32], strides = [1, 1]} : vector<8x128xf32> to vector<8x32xf32>
    %192 = vector.extract_strided_slice %187 {offsets = [0, 96], sizes = [8, 32], strides = [1, 1]} : vector<8x128xf32> to vector<8x32xf32>
    %193 = arith.mulf %190, %177 : vector<8x32xf32>
    %194 = arith.mulf %189, %191 : vector<8x32xf32>
    %195 = arith.addf %193, %194 : vector<8x32xf32>
    %196 = math.tanh %195 : vector<8x32xf32>
    %197 = arith.mulf %192, %196 : vector<8x32xf32>
    %198 = vector.extract_strided_slice %158 {offsets = [16, 0], sizes = [8, 128], strides = [1, 1]} : vector<64x128xf32> to vector<8x128xf32>
    %cst_38 = arith.constant dense<0.000000e+00> : vector<8x128xf32>
    %199 = tpu.matmul %197, %159, %cst_38 {dimension_numbers = #tpu.dot_dimension_numbers<[1], [0], [0], [1], [0, 0, 1, 1], [], []>} : vector<8x32xf32>, vector<32x128xf32>, vector<8x128xf32> -> vector<8x128xf32>
    %200 = arith.addf %198, %199 : vector<8x128xf32>
    %201 = arith.negf %200 : vector<8x128xf32>
    %202 = math.exp %201 : vector<8x128xf32>
    %cst_39 = arith.constant 1.000000e+00 : f32
    %203 = vector.broadcast %cst_39 : f32 to vector<8x128xf32>
    %204 = arith.addf %203, %202 : vector<8x128xf32>
    %205 = arith.divf %203, %204 : vector<8x128xf32>
    %206 = math.tanh %200 : vector<8x128xf32>
    %207 = vector.extract_strided_slice %205 {offsets = [0, 0], sizes = [8, 32], strides = [1, 1]} : vector<8x128xf32> to vector<8x32xf32>
    %208 = vector.extract_strided_slice %205 {offsets = [0, 32], sizes = [8, 32], strides = [1, 1]} : vector<8x128xf32> to vector<8x32xf32>
    %209 = vector.extract_strided_slice %206 {offsets = [0, 64], sizes = [8, 32], strides = [1, 1]} : vector<8x128xf32> to vector<8x32xf32>
    %210 = vector.extract_strided_slice %205 {offsets = [0, 96], sizes = [8, 32], strides = [1, 1]} : vector<8x128xf32> to vector<8x32xf32>
    %211 = arith.mulf %208, %195 : vector<8x32xf32>
    %212 = arith.mulf %207, %209 : vector<8x32xf32>
    %213 = arith.addf %211, %212 : vector<8x32xf32>
    %214 = math.tanh %213 : vector<8x32xf32>
    %215 = arith.mulf %210, %214 : vector<8x32xf32>
    %216 = vector.extract_strided_slice %158 {offsets = [24, 0], sizes = [8, 128], strides = [1, 1]} : vector<64x128xf32> to vector<8x128xf32>
    %cst_40 = arith.constant dense<0.000000e+00> : vector<8x128xf32>
    %217 = tpu.matmul %215, %159, %cst_40 {dimension_numbers = #tpu.dot_dimension_numbers<[1], [0], [0], [1], [0, 0, 1, 1], [], []>} : vector<8x32xf32>, vector<32x128xf32>, vector<8x128xf32> -> vector<8x128xf32>
    %218 = arith.addf %216, %217 : vector<8x128xf32>
    %219 = arith.negf %218 : vector<8x128xf32>
    %220 = math.exp %219 : vector<8x128xf32>
    %cst_41 = arith.constant 1.000000e+00 : f32
    %221 = vector.broadcast %cst_41 : f32 to vector<8x128xf32>
    %222 = arith.addf %221, %220 : vector<8x128xf32>
    %223 = arith.divf %221, %222 : vector<8x128xf32>
    %224 = math.tanh %218 : vector<8x128xf32>
    %225 = vector.extract_strided_slice %223 {offsets = [0, 0], sizes = [8, 32], strides = [1, 1]} : vector<8x128xf32> to vector<8x32xf32>
    %226 = vector.extract_strided_slice %223 {offsets = [0, 32], sizes = [8, 32], strides = [1, 1]} : vector<8x128xf32> to vector<8x32xf32>
    %227 = vector.extract_strided_slice %224 {offsets = [0, 64], sizes = [8, 32], strides = [1, 1]} : vector<8x128xf32> to vector<8x32xf32>
    %228 = vector.extract_strided_slice %223 {offsets = [0, 96], sizes = [8, 32], strides = [1, 1]} : vector<8x128xf32> to vector<8x32xf32>
    %229 = arith.mulf %226, %213 : vector<8x32xf32>
    %230 = arith.mulf %225, %227 : vector<8x32xf32>
    %231 = arith.addf %229, %230 : vector<8x32xf32>
    %232 = math.tanh %231 : vector<8x32xf32>
    %233 = arith.mulf %228, %232 : vector<8x32xf32>
    %234 = vector.extract_strided_slice %158 {offsets = [32, 0], sizes = [8, 128], strides = [1, 1]} : vector<64x128xf32> to vector<8x128xf32>
    %cst_42 = arith.constant dense<0.000000e+00> : vector<8x128xf32>
    %235 = tpu.matmul %233, %159, %cst_42 {dimension_numbers = #tpu.dot_dimension_numbers<[1], [0], [0], [1], [0, 0, 1, 1], [], []>} : vector<8x32xf32>, vector<32x128xf32>, vector<8x128xf32> -> vector<8x128xf32>
    %236 = arith.addf %234, %235 : vector<8x128xf32>
    %237 = arith.negf %236 : vector<8x128xf32>
    %238 = math.exp %237 : vector<8x128xf32>
    %cst_43 = arith.constant 1.000000e+00 : f32
    %239 = vector.broadcast %cst_43 : f32 to vector<8x128xf32>
    %240 = arith.addf %239, %238 : vector<8x128xf32>
    %241 = arith.divf %239, %240 : vector<8x128xf32>
    %242 = math.tanh %236 : vector<8x128xf32>
    %243 = vector.extract_strided_slice %241 {offsets = [0, 0], sizes = [8, 32], strides = [1, 1]} : vector<8x128xf32> to vector<8x32xf32>
    %244 = vector.extract_strided_slice %241 {offsets = [0, 32], sizes = [8, 32], strides = [1, 1]} : vector<8x128xf32> to vector<8x32xf32>
    %245 = vector.extract_strided_slice %242 {offsets = [0, 64], sizes = [8, 32], strides = [1, 1]} : vector<8x128xf32> to vector<8x32xf32>
    %246 = vector.extract_strided_slice %241 {offsets = [0, 96], sizes = [8, 32], strides = [1, 1]} : vector<8x128xf32> to vector<8x32xf32>
    %247 = arith.mulf %244, %231 : vector<8x32xf32>
    %248 = arith.mulf %243, %245 : vector<8x32xf32>
    %249 = arith.addf %247, %248 : vector<8x32xf32>
    %250 = math.tanh %249 : vector<8x32xf32>
    %251 = arith.mulf %246, %250 : vector<8x32xf32>
    %252 = vector.extract_strided_slice %158 {offsets = [40, 0], sizes = [8, 128], strides = [1, 1]} : vector<64x128xf32> to vector<8x128xf32>
    %cst_44 = arith.constant dense<0.000000e+00> : vector<8x128xf32>
    %253 = tpu.matmul %251, %159, %cst_44 {dimension_numbers = #tpu.dot_dimension_numbers<[1], [0], [0], [1], [0, 0, 1, 1], [], []>} : vector<8x32xf32>, vector<32x128xf32>, vector<8x128xf32> -> vector<8x128xf32>
    %254 = arith.addf %252, %253 : vector<8x128xf32>
    %255 = arith.negf %254 : vector<8x128xf32>
    %256 = math.exp %255 : vector<8x128xf32>
    %cst_45 = arith.constant 1.000000e+00 : f32
    %257 = vector.broadcast %cst_45 : f32 to vector<8x128xf32>
    %258 = arith.addf %257, %256 : vector<8x128xf32>
    %259 = arith.divf %257, %258 : vector<8x128xf32>
    %260 = math.tanh %254 : vector<8x128xf32>
    %261 = vector.extract_strided_slice %259 {offsets = [0, 0], sizes = [8, 32], strides = [1, 1]} : vector<8x128xf32> to vector<8x32xf32>
    %262 = vector.extract_strided_slice %259 {offsets = [0, 32], sizes = [8, 32], strides = [1, 1]} : vector<8x128xf32> to vector<8x32xf32>
    %263 = vector.extract_strided_slice %260 {offsets = [0, 64], sizes = [8, 32], strides = [1, 1]} : vector<8x128xf32> to vector<8x32xf32>
    %264 = vector.extract_strided_slice %259 {offsets = [0, 96], sizes = [8, 32], strides = [1, 1]} : vector<8x128xf32> to vector<8x32xf32>
    %265 = arith.mulf %262, %249 : vector<8x32xf32>
    %266 = arith.mulf %261, %263 : vector<8x32xf32>
    %267 = arith.addf %265, %266 : vector<8x32xf32>
    %268 = math.tanh %267 : vector<8x32xf32>
    %269 = arith.mulf %264, %268 : vector<8x32xf32>
    %270 = vector.extract_strided_slice %158 {offsets = [48, 0], sizes = [8, 128], strides = [1, 1]} : vector<64x128xf32> to vector<8x128xf32>
    %cst_46 = arith.constant dense<0.000000e+00> : vector<8x128xf32>
    %271 = tpu.matmul %269, %159, %cst_46 {dimension_numbers = #tpu.dot_dimension_numbers<[1], [0], [0], [1], [0, 0, 1, 1], [], []>} : vector<8x32xf32>, vector<32x128xf32>, vector<8x128xf32> -> vector<8x128xf32>
    %272 = arith.addf %270, %271 : vector<8x128xf32>
    %273 = arith.negf %272 : vector<8x128xf32>
    %274 = math.exp %273 : vector<8x128xf32>
    %cst_47 = arith.constant 1.000000e+00 : f32
    %275 = vector.broadcast %cst_47 : f32 to vector<8x128xf32>
    %276 = arith.addf %275, %274 : vector<8x128xf32>
    %277 = arith.divf %275, %276 : vector<8x128xf32>
    %278 = math.tanh %272 : vector<8x128xf32>
    %279 = vector.extract_strided_slice %277 {offsets = [0, 0], sizes = [8, 32], strides = [1, 1]} : vector<8x128xf32> to vector<8x32xf32>
    %280 = vector.extract_strided_slice %277 {offsets = [0, 32], sizes = [8, 32], strides = [1, 1]} : vector<8x128xf32> to vector<8x32xf32>
    %281 = vector.extract_strided_slice %278 {offsets = [0, 64], sizes = [8, 32], strides = [1, 1]} : vector<8x128xf32> to vector<8x32xf32>
    %282 = vector.extract_strided_slice %277 {offsets = [0, 96], sizes = [8, 32], strides = [1, 1]} : vector<8x128xf32> to vector<8x32xf32>
    %283 = arith.mulf %280, %267 : vector<8x32xf32>
    %284 = arith.mulf %279, %281 : vector<8x32xf32>
    %285 = arith.addf %283, %284 : vector<8x32xf32>
    %286 = math.tanh %285 : vector<8x32xf32>
    %287 = arith.mulf %282, %286 : vector<8x32xf32>
    %288 = vector.extract_strided_slice %158 {offsets = [56, 0], sizes = [8, 128], strides = [1, 1]} : vector<64x128xf32> to vector<8x128xf32>
    %cst_48 = arith.constant dense<0.000000e+00> : vector<8x128xf32>
    %289 = tpu.matmul %287, %159, %cst_48 {dimension_numbers = #tpu.dot_dimension_numbers<[1], [0], [0], [1], [0, 0, 1, 1], [], []>} : vector<8x32xf32>, vector<32x128xf32>, vector<8x128xf32> -> vector<8x128xf32>
    %290 = arith.addf %288, %289 : vector<8x128xf32>
    %291 = arith.negf %290 : vector<8x128xf32>
    %292 = math.exp %291 : vector<8x128xf32>
    %cst_49 = arith.constant 1.000000e+00 : f32
    %293 = vector.broadcast %cst_49 : f32 to vector<8x128xf32>
    %294 = arith.addf %293, %292 : vector<8x128xf32>
    %295 = arith.divf %293, %294 : vector<8x128xf32>
    %296 = math.tanh %290 : vector<8x128xf32>
    %297 = vector.extract_strided_slice %295 {offsets = [0, 0], sizes = [8, 32], strides = [1, 1]} : vector<8x128xf32> to vector<8x32xf32>
    %298 = vector.extract_strided_slice %295 {offsets = [0, 32], sizes = [8, 32], strides = [1, 1]} : vector<8x128xf32> to vector<8x32xf32>
    %299 = vector.extract_strided_slice %296 {offsets = [0, 64], sizes = [8, 32], strides = [1, 1]} : vector<8x128xf32> to vector<8x32xf32>
    %300 = vector.extract_strided_slice %295 {offsets = [0, 96], sizes = [8, 32], strides = [1, 1]} : vector<8x128xf32> to vector<8x32xf32>
    %301 = arith.mulf %298, %285 : vector<8x32xf32>
    %302 = arith.mulf %297, %299 : vector<8x32xf32>
    %303 = arith.addf %301, %302 : vector<8x32xf32>
    %304 = math.tanh %303 : vector<8x32xf32>
    %305 = arith.mulf %300, %304 : vector<8x32xf32>
    %306 = tpu.concatenate %179, %197, %215, %233, %251, %269, %287, %305 in 0 : vector<8x32xf32>, vector<8x32xf32>, vector<8x32xf32>, vector<8x32xf32>, vector<8x32xf32>, vector<8x32xf32>, vector<8x32xf32>, vector<8x32xf32> -> vector<64x32xf32>
    %c0_50 = arith.constant 0 : index
    %c0_51 = arith.constant 0 : index
    %307 = vector.load %arg7[%c0_50, %c0_51] : memref<32x128xf32, #tpu.memory_space<vmem>>, vector<32x128xf32>
    %cst_52 = arith.constant dense<0.000000e+00> : vector<64x128xf32>
    %308 = tpu.matmul %306, %307, %cst_52 {dimension_numbers = #tpu.dot_dimension_numbers<[1], [0], [0], [1], [0, 0, 1, 1], [], []>} : vector<64x32xf32>, vector<32x128xf32>, vector<64x128xf32> -> vector<64x128xf32>
    %c0_53 = arith.constant 0 : index
    %c0_54 = arith.constant 0 : index
    %309 = vector.load %arg9[%c0_53, %c0_54] : memref<1x128xf32, #tpu.memory_space<vmem>>, vector<1x128xf32>
    %310 = vector.broadcast %309 : vector<1x128xf32> to vector<64x128xf32>
    %311 = arith.addf %308, %310 : vector<64x128xf32>
    %c0_55 = arith.constant 0 : index
    %c0_56 = arith.constant 0 : index
    %312 = vector.load %arg8[%c0_55, %c0_56] : memref<32x128xf32, #tpu.memory_space<vmem>>, vector<32x128xf32>
    %cst_57 = arith.constant 0.000000e+00 : f32
    %313 = vector.broadcast %cst_57 : f32 to vector<8x32xf32>
    %cst_58 = arith.constant 0.000000e+00 : f32
    %314 = vector.broadcast %cst_58 : f32 to vector<8x32xf32>
    %315 = vector.extract_strided_slice %311 {offsets = [0, 0], sizes = [8, 128], strides = [1, 1]} : vector<64x128xf32> to vector<8x128xf32>
    %cst_59 = arith.constant dense<0.000000e+00> : vector<8x128xf32>
    %316 = tpu.matmul %313, %312, %cst_59 {dimension_numbers = #tpu.dot_dimension_numbers<[1], [0], [0], [1], [0, 0, 1, 1], [], []>} : vector<8x32xf32>, vector<32x128xf32>, vector<8x128xf32> -> vector<8x128xf32>
    %317 = arith.addf %315, %316 : vector<8x128xf32>
    %318 = arith.negf %317 : vector<8x128xf32>
    %319 = math.exp %318 : vector<8x128xf32>
    %cst_60 = arith.constant 1.000000e+00 : f32
    %320 = vector.broadcast %cst_60 : f32 to vector<8x128xf32>
    %321 = arith.addf %320, %319 : vector<8x128xf32>
    %322 = arith.divf %320, %321 : vector<8x128xf32>
    %323 = math.tanh %317 : vector<8x128xf32>
    %324 = vector.extract_strided_slice %322 {offsets = [0, 0], sizes = [8, 32], strides = [1, 1]} : vector<8x128xf32> to vector<8x32xf32>
    %325 = vector.extract_strided_slice %322 {offsets = [0, 32], sizes = [8, 32], strides = [1, 1]} : vector<8x128xf32> to vector<8x32xf32>
    %326 = vector.extract_strided_slice %323 {offsets = [0, 64], sizes = [8, 32], strides = [1, 1]} : vector<8x128xf32> to vector<8x32xf32>
    %327 = vector.extract_strided_slice %322 {offsets = [0, 96], sizes = [8, 32], strides = [1, 1]} : vector<8x128xf32> to vector<8x32xf32>
    %328 = arith.mulf %325, %314 : vector<8x32xf32>
    %329 = arith.mulf %324, %326 : vector<8x32xf32>
    %330 = arith.addf %328, %329 : vector<8x32xf32>
    %331 = math.tanh %330 : vector<8x32xf32>
    %332 = arith.mulf %327, %331 : vector<8x32xf32>
    %333 = vector.extract_strided_slice %311 {offsets = [8, 0], sizes = [8, 128], strides = [1, 1]} : vector<64x128xf32> to vector<8x128xf32>
    %cst_61 = arith.constant dense<0.000000e+00> : vector<8x128xf32>
    %334 = tpu.matmul %332, %312, %cst_61 {dimension_numbers = #tpu.dot_dimension_numbers<[1], [0], [0], [1], [0, 0, 1, 1], [], []>} : vector<8x32xf32>, vector<32x128xf32>, vector<8x128xf32> -> vector<8x128xf32>
    %335 = arith.addf %333, %334 : vector<8x128xf32>
    %336 = arith.negf %335 : vector<8x128xf32>
    %337 = math.exp %336 : vector<8x128xf32>
    %cst_62 = arith.constant 1.000000e+00 : f32
    %338 = vector.broadcast %cst_62 : f32 to vector<8x128xf32>
    %339 = arith.addf %338, %337 : vector<8x128xf32>
    %340 = arith.divf %338, %339 : vector<8x128xf32>
    %341 = math.tanh %335 : vector<8x128xf32>
    %342 = vector.extract_strided_slice %340 {offsets = [0, 0], sizes = [8, 32], strides = [1, 1]} : vector<8x128xf32> to vector<8x32xf32>
    %343 = vector.extract_strided_slice %340 {offsets = [0, 32], sizes = [8, 32], strides = [1, 1]} : vector<8x128xf32> to vector<8x32xf32>
    %344 = vector.extract_strided_slice %341 {offsets = [0, 64], sizes = [8, 32], strides = [1, 1]} : vector<8x128xf32> to vector<8x32xf32>
    %345 = vector.extract_strided_slice %340 {offsets = [0, 96], sizes = [8, 32], strides = [1, 1]} : vector<8x128xf32> to vector<8x32xf32>
    %346 = arith.mulf %343, %330 : vector<8x32xf32>
    %347 = arith.mulf %342, %344 : vector<8x32xf32>
    %348 = arith.addf %346, %347 : vector<8x32xf32>
    %349 = math.tanh %348 : vector<8x32xf32>
    %350 = arith.mulf %345, %349 : vector<8x32xf32>
    %351 = vector.extract_strided_slice %311 {offsets = [16, 0], sizes = [8, 128], strides = [1, 1]} : vector<64x128xf32> to vector<8x128xf32>
    %cst_63 = arith.constant dense<0.000000e+00> : vector<8x128xf32>
    %352 = tpu.matmul %350, %312, %cst_63 {dimension_numbers = #tpu.dot_dimension_numbers<[1], [0], [0], [1], [0, 0, 1, 1], [], []>} : vector<8x32xf32>, vector<32x128xf32>, vector<8x128xf32> -> vector<8x128xf32>
    %353 = arith.addf %351, %352 : vector<8x128xf32>
    %354 = arith.negf %353 : vector<8x128xf32>
    %355 = math.exp %354 : vector<8x128xf32>
    %cst_64 = arith.constant 1.000000e+00 : f32
    %356 = vector.broadcast %cst_64 : f32 to vector<8x128xf32>
    %357 = arith.addf %356, %355 : vector<8x128xf32>
    %358 = arith.divf %356, %357 : vector<8x128xf32>
    %359 = math.tanh %353 : vector<8x128xf32>
    %360 = vector.extract_strided_slice %358 {offsets = [0, 0], sizes = [8, 32], strides = [1, 1]} : vector<8x128xf32> to vector<8x32xf32>
    %361 = vector.extract_strided_slice %358 {offsets = [0, 32], sizes = [8, 32], strides = [1, 1]} : vector<8x128xf32> to vector<8x32xf32>
    %362 = vector.extract_strided_slice %359 {offsets = [0, 64], sizes = [8, 32], strides = [1, 1]} : vector<8x128xf32> to vector<8x32xf32>
    %363 = vector.extract_strided_slice %358 {offsets = [0, 96], sizes = [8, 32], strides = [1, 1]} : vector<8x128xf32> to vector<8x32xf32>
    %364 = arith.mulf %361, %348 : vector<8x32xf32>
    %365 = arith.mulf %360, %362 : vector<8x32xf32>
    %366 = arith.addf %364, %365 : vector<8x32xf32>
    %367 = math.tanh %366 : vector<8x32xf32>
    %368 = arith.mulf %363, %367 : vector<8x32xf32>
    %369 = vector.extract_strided_slice %311 {offsets = [24, 0], sizes = [8, 128], strides = [1, 1]} : vector<64x128xf32> to vector<8x128xf32>
    %cst_65 = arith.constant dense<0.000000e+00> : vector<8x128xf32>
    %370 = tpu.matmul %368, %312, %cst_65 {dimension_numbers = #tpu.dot_dimension_numbers<[1], [0], [0], [1], [0, 0, 1, 1], [], []>} : vector<8x32xf32>, vector<32x128xf32>, vector<8x128xf32> -> vector<8x128xf32>
    %371 = arith.addf %369, %370 : vector<8x128xf32>
    %372 = arith.negf %371 : vector<8x128xf32>
    %373 = math.exp %372 : vector<8x128xf32>
    %cst_66 = arith.constant 1.000000e+00 : f32
    %374 = vector.broadcast %cst_66 : f32 to vector<8x128xf32>
    %375 = arith.addf %374, %373 : vector<8x128xf32>
    %376 = arith.divf %374, %375 : vector<8x128xf32>
    %377 = math.tanh %371 : vector<8x128xf32>
    %378 = vector.extract_strided_slice %376 {offsets = [0, 0], sizes = [8, 32], strides = [1, 1]} : vector<8x128xf32> to vector<8x32xf32>
    %379 = vector.extract_strided_slice %376 {offsets = [0, 32], sizes = [8, 32], strides = [1, 1]} : vector<8x128xf32> to vector<8x32xf32>
    %380 = vector.extract_strided_slice %377 {offsets = [0, 64], sizes = [8, 32], strides = [1, 1]} : vector<8x128xf32> to vector<8x32xf32>
    %381 = vector.extract_strided_slice %376 {offsets = [0, 96], sizes = [8, 32], strides = [1, 1]} : vector<8x128xf32> to vector<8x32xf32>
    %382 = arith.mulf %379, %366 : vector<8x32xf32>
    %383 = arith.mulf %378, %380 : vector<8x32xf32>
    %384 = arith.addf %382, %383 : vector<8x32xf32>
    %385 = math.tanh %384 : vector<8x32xf32>
    %386 = arith.mulf %381, %385 : vector<8x32xf32>
    %387 = vector.extract_strided_slice %311 {offsets = [32, 0], sizes = [8, 128], strides = [1, 1]} : vector<64x128xf32> to vector<8x128xf32>
    %cst_67 = arith.constant dense<0.000000e+00> : vector<8x128xf32>
    %388 = tpu.matmul %386, %312, %cst_67 {dimension_numbers = #tpu.dot_dimension_numbers<[1], [0], [0], [1], [0, 0, 1, 1], [], []>} : vector<8x32xf32>, vector<32x128xf32>, vector<8x128xf32> -> vector<8x128xf32>
    %389 = arith.addf %387, %388 : vector<8x128xf32>
    %390 = arith.negf %389 : vector<8x128xf32>
    %391 = math.exp %390 : vector<8x128xf32>
    %cst_68 = arith.constant 1.000000e+00 : f32
    %392 = vector.broadcast %cst_68 : f32 to vector<8x128xf32>
    %393 = arith.addf %392, %391 : vector<8x128xf32>
    %394 = arith.divf %392, %393 : vector<8x128xf32>
    %395 = math.tanh %389 : vector<8x128xf32>
    %396 = vector.extract_strided_slice %394 {offsets = [0, 0], sizes = [8, 32], strides = [1, 1]} : vector<8x128xf32> to vector<8x32xf32>
    %397 = vector.extract_strided_slice %394 {offsets = [0, 32], sizes = [8, 32], strides = [1, 1]} : vector<8x128xf32> to vector<8x32xf32>
    %398 = vector.extract_strided_slice %395 {offsets = [0, 64], sizes = [8, 32], strides = [1, 1]} : vector<8x128xf32> to vector<8x32xf32>
    %399 = vector.extract_strided_slice %394 {offsets = [0, 96], sizes = [8, 32], strides = [1, 1]} : vector<8x128xf32> to vector<8x32xf32>
    %400 = arith.mulf %397, %384 : vector<8x32xf32>
    %401 = arith.mulf %396, %398 : vector<8x32xf32>
    %402 = arith.addf %400, %401 : vector<8x32xf32>
    %403 = math.tanh %402 : vector<8x32xf32>
    %404 = arith.mulf %399, %403 : vector<8x32xf32>
    %405 = vector.extract_strided_slice %311 {offsets = [40, 0], sizes = [8, 128], strides = [1, 1]} : vector<64x128xf32> to vector<8x128xf32>
    %cst_69 = arith.constant dense<0.000000e+00> : vector<8x128xf32>
    %406 = tpu.matmul %404, %312, %cst_69 {dimension_numbers = #tpu.dot_dimension_numbers<[1], [0], [0], [1], [0, 0, 1, 1], [], []>} : vector<8x32xf32>, vector<32x128xf32>, vector<8x128xf32> -> vector<8x128xf32>
    %407 = arith.addf %405, %406 : vector<8x128xf32>
    %408 = arith.negf %407 : vector<8x128xf32>
    %409 = math.exp %408 : vector<8x128xf32>
    %cst_70 = arith.constant 1.000000e+00 : f32
    %410 = vector.broadcast %cst_70 : f32 to vector<8x128xf32>
    %411 = arith.addf %410, %409 : vector<8x128xf32>
    %412 = arith.divf %410, %411 : vector<8x128xf32>
    %413 = math.tanh %407 : vector<8x128xf32>
    %414 = vector.extract_strided_slice %412 {offsets = [0, 0], sizes = [8, 32], strides = [1, 1]} : vector<8x128xf32> to vector<8x32xf32>
    %415 = vector.extract_strided_slice %412 {offsets = [0, 32], sizes = [8, 32], strides = [1, 1]} : vector<8x128xf32> to vector<8x32xf32>
    %416 = vector.extract_strided_slice %413 {offsets = [0, 64], sizes = [8, 32], strides = [1, 1]} : vector<8x128xf32> to vector<8x32xf32>
    %417 = vector.extract_strided_slice %412 {offsets = [0, 96], sizes = [8, 32], strides = [1, 1]} : vector<8x128xf32> to vector<8x32xf32>
    %418 = arith.mulf %415, %402 : vector<8x32xf32>
    %419 = arith.mulf %414, %416 : vector<8x32xf32>
    %420 = arith.addf %418, %419 : vector<8x32xf32>
    %421 = math.tanh %420 : vector<8x32xf32>
    %422 = arith.mulf %417, %421 : vector<8x32xf32>
    %423 = vector.extract_strided_slice %311 {offsets = [48, 0], sizes = [8, 128], strides = [1, 1]} : vector<64x128xf32> to vector<8x128xf32>
    %cst_71 = arith.constant dense<0.000000e+00> : vector<8x128xf32>
    %424 = tpu.matmul %422, %312, %cst_71 {dimension_numbers = #tpu.dot_dimension_numbers<[1], [0], [0], [1], [0, 0, 1, 1], [], []>} : vector<8x32xf32>, vector<32x128xf32>, vector<8x128xf32> -> vector<8x128xf32>
    %425 = arith.addf %423, %424 : vector<8x128xf32>
    %426 = arith.negf %425 : vector<8x128xf32>
    %427 = math.exp %426 : vector<8x128xf32>
    %cst_72 = arith.constant 1.000000e+00 : f32
    %428 = vector.broadcast %cst_72 : f32 to vector<8x128xf32>
    %429 = arith.addf %428, %427 : vector<8x128xf32>
    %430 = arith.divf %428, %429 : vector<8x128xf32>
    %431 = math.tanh %425 : vector<8x128xf32>
    %432 = vector.extract_strided_slice %430 {offsets = [0, 0], sizes = [8, 32], strides = [1, 1]} : vector<8x128xf32> to vector<8x32xf32>
    %433 = vector.extract_strided_slice %430 {offsets = [0, 32], sizes = [8, 32], strides = [1, 1]} : vector<8x128xf32> to vector<8x32xf32>
    %434 = vector.extract_strided_slice %431 {offsets = [0, 64], sizes = [8, 32], strides = [1, 1]} : vector<8x128xf32> to vector<8x32xf32>
    %435 = vector.extract_strided_slice %430 {offsets = [0, 96], sizes = [8, 32], strides = [1, 1]} : vector<8x128xf32> to vector<8x32xf32>
    %436 = arith.mulf %433, %420 : vector<8x32xf32>
    %437 = arith.mulf %432, %434 : vector<8x32xf32>
    %438 = arith.addf %436, %437 : vector<8x32xf32>
    %439 = math.tanh %438 : vector<8x32xf32>
    %440 = arith.mulf %435, %439 : vector<8x32xf32>
    %441 = vector.extract_strided_slice %311 {offsets = [56, 0], sizes = [8, 128], strides = [1, 1]} : vector<64x128xf32> to vector<8x128xf32>
    %cst_73 = arith.constant dense<0.000000e+00> : vector<8x128xf32>
    %442 = tpu.matmul %440, %312, %cst_73 {dimension_numbers = #tpu.dot_dimension_numbers<[1], [0], [0], [1], [0, 0, 1, 1], [], []>} : vector<8x32xf32>, vector<32x128xf32>, vector<8x128xf32> -> vector<8x128xf32>
    %443 = arith.addf %441, %442 : vector<8x128xf32>
    %444 = arith.negf %443 : vector<8x128xf32>
    %445 = math.exp %444 : vector<8x128xf32>
    %cst_74 = arith.constant 1.000000e+00 : f32
    %446 = vector.broadcast %cst_74 : f32 to vector<8x128xf32>
    %447 = arith.addf %446, %445 : vector<8x128xf32>
    %448 = arith.divf %446, %447 : vector<8x128xf32>
    %449 = math.tanh %443 : vector<8x128xf32>
    %450 = vector.extract_strided_slice %448 {offsets = [0, 0], sizes = [8, 32], strides = [1, 1]} : vector<8x128xf32> to vector<8x32xf32>
    %451 = vector.extract_strided_slice %448 {offsets = [0, 32], sizes = [8, 32], strides = [1, 1]} : vector<8x128xf32> to vector<8x32xf32>
    %452 = vector.extract_strided_slice %449 {offsets = [0, 64], sizes = [8, 32], strides = [1, 1]} : vector<8x128xf32> to vector<8x32xf32>
    %453 = vector.extract_strided_slice %448 {offsets = [0, 96], sizes = [8, 32], strides = [1, 1]} : vector<8x128xf32> to vector<8x32xf32>
    %454 = arith.mulf %451, %438 : vector<8x32xf32>
    %455 = arith.mulf %450, %452 : vector<8x32xf32>
    %456 = arith.addf %454, %455 : vector<8x32xf32>
    %457 = math.tanh %456 : vector<8x32xf32>
    %458 = arith.mulf %453, %457 : vector<8x32xf32>
    %c0_75 = arith.constant 0 : index
    %c0_76 = arith.constant 0 : index
    %459 = vector.load %arg10[%c0_75, %c0_76] : memref<32x128xf32, #tpu.memory_space<vmem>>, vector<32x128xf32>
    %cst_77 = arith.constant dense<0.000000e+00> : vector<8x128xf32>
    %460 = tpu.matmul %458, %459, %cst_77 {dimension_numbers = #tpu.dot_dimension_numbers<[1], [0], [0], [1], [0, 0, 1, 1], [], []>} : vector<8x32xf32>, vector<32x128xf32>, vector<8x128xf32> -> vector<8x128xf32>
    %c0_78 = arith.constant 0 : index
    %c0_79 = arith.constant 0 : index
    %461 = vector.load %arg11[%c0_78, %c0_79] : memref<1x128xf32, #tpu.memory_space<vmem>>, vector<1x128xf32>
    %462 = vector.broadcast %461 : vector<1x128xf32> to vector<8x128xf32>
    %463 = arith.addf %460, %462 : vector<8x128xf32>
    %c0_80 = arith.constant 0 : index
    %c0_81 = arith.constant 0 : index
    %464 = vector.load %arg12[%c0_80, %c0_81] : memref<8x128xf32, #tpu.memory_space<vmem>>, vector<8x128xf32>
    tpu.vector_store %arg12[%c0_80, %c0_81], %463 {strides = array<i32>} : memref<8x128xf32, #tpu.memory_space<vmem>>, vector<8x128xf32>,
    return
  }
}

</mosaic_0001>

<bundles_post_ra>
// kernel: lstm_classification_forward.1
= control target key start
LH: loop header
LB: loop body
LE: loop exit
PB: predicated region body
PF: predicated region fallthrough
CT: control target
= control target key end

     0   :  { %17 = vsyncpa [#allocation3], 0  ;;  %s4614_s0 = inlined_call_operand.vmem [shape: f32[64,16], index: 0, kind: input, shape index: {}]   ;;  %s4615_s1 = inlined_call_operand.hbm [shape: f32[16,128], index: 1, kind: input, shape index: {}]   ;;  %s4616_s2 = inlined_call_operand.vmem [shape: f32[32,128], index: 2, kind: input, shape index: {}]   ;;  %s4617_s3 = inlined_call_operand.vmem [shape: f32[1,128], index: 3, kind: input, shape index: {}]   ;;  %s4618_s4 = inlined_call_operand.vmem [shape: f32[32,128], index: 4, kind: input, shape index: {}]   ;;  %s4619_s5 = inlined_call_operand.vmem [shape: f32[32,128], index: 5, kind: input, shape index: {}]   ;;  %s4620_s6 = inlined_call_operand.vmem [shape: f32[1,128], index: 6, kind: input, shape index: {}]   ;;  %s4621_s7 = inlined_call_operand.vmem [shape: f32[32,128], index: 7, kind: input, shape index: {}]   ;;  %s4622_s8 = inlined_call_operand.hbm [shape: f32[32,128], index: 8, kind: input, shape index: {}]   ;;  %s4623_s9 = inlined_call_operand.vmem [shape: f32[1,128], index: 9, kind: input, shape index: {}]   ;;  %s4624_s10 = inlined_call_operand.hbm [shape: f32[32,128], index: 10, kind: input, shape index: {}]   ;;  %s4625_s11 = inlined_call_operand.vmem [shape: f32[1,128], index: 11, kind: input, shape index: {}]   ;;  %s4626_s12 = inlined_call_operand.vmem [shape: f32[8,128], index: 12, kind: output, shape index: {}]  }
   0x1   :  { %18 = vsyncpa [#allocation5], 0  ;;  %s3971_s21 = smov [#allocation4]   ;;  %s3972_s23 = smov [#allocation2]  }
   0x2   :  { %s50_s22 = sshll.u32 %s3971_s21, 4  ;;  %s26_s24 = sshll.u32 %s3972_s23, 4  ;;  %s51_s22 = int_to_ptr.vmem [resolvable:$true] %s50_s22  ;;  %s4046_s24 = int_to_ptr.vmem [resolvable:$true] %s26_s24 }
   0x3   :  { %s3901_s27 = scalar_lea.hbm %s4622_s8, 512 }
   0x4   :  { %p3902_p0 = scmp.ne.s32.totalorder %s4622_s8, %s3901_s27  ;;  %p3905_p1 = scmp.lt.u32.totalorder %s3901_s27, %s4622_s8 }
   0x6   :  { %p3907_p2 = pnand %p3905_p1, %p3902_p0 }
   0x8   :  { %3910 = shalt.err (!%p3907_p2)
}
   0x9   :  { %s3911_s14 = scalar_lea.vmem %s51_s22, 512  ;;  %p3916_p4 = scmp.lt.s32.totalorder %s51_s22, %s51_s22 }
   0xa   :  { %p3912_p3 = scmp.ne.s32.totalorder %s51_s22, %s3911_s14  ;;  %p3917_p5 = scmp.lt.s32.totalorder %s3911_s14, %s3911_s14 }
   0xc   :  { %p3918_p6 = por %p3917_p5, %p3916_p4 }
   0xe   :  { %p3919_p7 = pnand %p3918_p6, %p3912_p3 }
  0x10   :  { %3922 = shalt.err (!%p3919_p7)
}
  0x11   :  { %s3973_s15 = smov 128   ;;  %s3974_s16 = smov 8  }
  0x12   :  { %56 = dma.hbm_to_vmem [thread:$0]  %s4622_s8, 512, %s51_s22, [#allocation5], %s3973_s15, %s3973_s15, %s3974_s16  }
  0x13   :  { %s3923_s21 = scalar_lea.hbm %s4615_s1, 256 }
  0x14   :  { %p3924_p8 = scmp.ne.s32.totalorder %s4615_s1, %s3923_s21  ;;  %p3927_p9 = scmp.lt.u32.totalorder %s3923_s21, %s4615_s1 }
  0x16   :  { %p3929_p10 = pnand %p3927_p9, %p3924_p8 }
  0x18   :  { %3932 = shalt.err (!%p3929_p10)
}
  0x19   :  { %s3933_s28 = scalar_lea.vmem %s4046_s24, 256  ;;  %p3938_p12 = scmp.lt.s32.totalorder %s4046_s24, %s4046_s24 }
  0x1a   :  { %p3934_p11 = scmp.ne.s32.totalorder %s4046_s24, %s3933_s28  ;;  %p3939_p13 = scmp.lt.s32.totalorder %s3933_s28, %s3933_s28 }
  0x1c   :  { %p3940_p0 = por %p3939_p13, %p3938_p12 }
  0x1e   :  { %p3941_p1 = pnand %p3940_p0, %p3934_p11 }
  0x20   :  { %3944 = shalt.err (!%p3941_p1)
}
  0x21   :  { %32 = dma.hbm_to_vmem [thread:$0]  %s4615_s1, 256, %s4046_s24, [#allocation3], %s3973_s15, %s3973_s15, %s3974_s16  }
  0x22   :  { %s3975_s29 = smov [#allocation6]   ;;  %s3945_s17 = scalar_lea.hbm %s4624_s10, 512 }
  0x23   :  { %s64_s30 = sshll.u32 %s3975_s29, 4  ;;  %p3946_p2 = scmp.ne.s32.totalorder %s4624_s10, %s3945_s17  ;;  %s65_s30 = int_to_ptr.vmem [resolvable:$true] %s64_s30 }
  0x24   :  { %p3949_p3 = scmp.lt.u32.totalorder %s3945_s17, %s4624_s10 }
  0x26   :  { %p3951_p4 = pnand %p3949_p3, %p3946_p2 }
  0x28   :  { %3954 = shalt.err (!%p3951_p4)
}
  0x29   :  { %s3955_s23 = scalar_lea.vmem %s65_s30, 512  ;;  %p3960_p6 = scmp.lt.s32.totalorder %s65_s30, %s65_s30 }
  0x2a   :  { %p3956_p5 = scmp.ne.s32.totalorder %s65_s30, %s3955_s23  ;;  %p3961_p7 = scmp.lt.s32.totalorder %s3955_s23, %s3955_s23 }
  0x2c   :  { %p3962_p8 = por %p3961_p7, %p3960_p6 }
  0x2e   :  { %p3963_p9 = pnand %p3962_p8, %p3956_p5 }
  0x30   :  { %3966 = shalt.err (!%p3963_p9)
}
  0x31   :  { %70 = dma.hbm_to_vmem [thread:$0]  %s4624_s10, 512, %s65_s30, [#allocation5], %s3973_s15, %s3973_s15, %s3974_s16  }
  0x32   :  { %3967 = dma.done.wait [#allocation3], 256  }
  0x33   :  { %3968 = vsyncadd [#allocation3], 4294967040 }
  0x34   :  { %3969 = dma.done.wait [#allocation5], 1024  }
  0x35   :  { %3970 = vsyncadd [#allocation5], 4294966272  ;;  %v3976_v0 = vmov 0.0|0.0   ;;  %vm3977_vm0 = vmmov 0   ;;  %v3978_v1 = vmov 0.0   ;;  %vm99_vm1 = vcmask 130048  }
  0x36   :  { %3533 = vmatprep.subr.bf16.mxu1 %v3976_v0  ;;  %3222 = vmatprep.mubr.msk.f32.mxu1 %vm3977_vm0, %v3978_v1  ;;  %v90_v2 = vld [vmem:[#allocation2] sm:$0xff]  ;;  %v91_v3 = vld [vmem:[#allocation2 + $0x8] sm:$0xff]  ;;  %v231_v9 = vld [vmem:[%s4616_s2 + $0x10] sm:$0xff]  ;;  %s3979_s17 = smov 64   ;;  %vm233_vm2 = vcmask 261120  }
  0x37   :  { %v229_v4 = vld [vmem:[%s4616_s2] sm:$0xff]  ;;  %v3529_v5 = vpack.c.bf16 %v91_v3, %v90_v2  ;;  %v230_v6 = vld [vmem:[%s4616_s2 + $0x8] sm:$0xff]  ;;  %v232_v10 = vld [vmem:[%s4616_s2 + $0x18] sm:$0xff] }
  0x38   :  { %v82_v7 = vld [vmem:[%s4614_s0] sm:$0xff]  ;;  %v4110_v8 = vpack.c.bf16 %v230_v6, %v229_v4  ;;  %v83_v11 = vld [vmem:[%s4614_s0 + $0x8] sm:$0xff]  ;;  %v4123_v12 = vpack.c.bf16 %v232_v10, %v231_v9  ;;  %v84_v48 = vld [vmem:[%s4614_s0 + $0x10] sm:$0xff] }
  0x39   :  { %3202 = vmatprep.mubr.msk.f32.mxu0 %vm99_vm1, %v82_v7  ;;  %3530 = vmatprep.subr.bf16.mxu0 %v3529_v5  ;;  %v4144_v13 = vld [vmem:[%s4617_s3] ss:$0 sm:$0xff]  ;;  %s3980_s3 = smov 32   ;;  %v85_v49 = vld [vmem:[%s4614_s0 + $0x18] sm:$0xff]  ;;  %v87_v51 = vld [vmem:[%s4614_s0 + $0x28] sm:$0xff] }
  0x3a   :  { %3535 = vmatpush3.bf16.msra.mxu1 %v4110_v8  ;;  %3532 = vmatpush3.bf16.msra.mxu0 %v3529_v5  ;;  %v86_v50 = vld [vmem:[%s4614_s0 + $0x20] sm:$0xff]  ;;  %v88_v52 = vld [vmem:[%s4614_s0 + $0x30] sm:$0xff]  ;;  %v89_v53 = vld [vmem:[%s4614_s0 + $0x38] sm:$0xff] }
  0x3b   :  { %3536 = vmatprep.subr.bf16.mxu1 %v3976_v0  ;;  %3545 = vmatprep.subr.bf16.mxu0 %v3976_v0 }
  0x3d   :  { %3203 = vmatmul.mubr.msk.f32.vlgmr.msra.gmra.mrb[0].mxu0 %vm99_vm1, %v83_v11 }
  0x3e   :  { %3538 = vmatpush3.bf16.msra.mxu1 %v4123_v12  ;;  %3547 = vmatpush3.bf16.msra.mxu0 %v4110_v8 }
  0x3f   :  { %3539 = vmatprep.subr.bf16.mxu1 %v3976_v0  ;;  %3548 = vmatprep.subr.bf16.mxu0 %v3976_v0 }
  0x40   :  { %3205 = vmatprep.mubr.msk.f32.mxu0 %vm99_vm1, %v84_v48 }
  0x41   :  { %3223 = vmatmul.mubr.f32.vlgmr.msra.gmra.mrb[0].mxu1 %v3978_v1  ;;  %3206 = vmatmul.mubr.msk.f32.gmra.mrb[2].mxu0 %vm99_vm1, %v85_v49 }
  0x42   :  { %3541 = vmatpush3.bf16.msra.mxu1 %v4110_v8  ;;  %3233 = vmatprep.mubr.msk.f32.mxu1 %vm3977_vm0, %v3978_v1 }
  0x43   :  { %3542 = vmatprep.subr.bf16.mxu1 %v3976_v0  ;;  %3550 = vmatpush3.bf16.msra.mxu0 %v4123_v12 }
  0x44   :  { %3557 = vmatprep.subr.bf16.mxu0 %v3976_v0  ;;  %3208 = vmatprep.mubr.msk.f32.mxu0 %vm99_vm1, %v86_v50 }
  0x45   :  { %3209 = vmatmul.mubr.msk.f32.gmra.mrb[4].mxu0 %vm99_vm1, %v87_v51 }
  0x46   :  { %3544 = vmatpush3.bf16.msra.mxu1 %v4123_v12  ;;  %3211 = vmatprep.mubr.msk.f32.mxu0 %vm99_vm1, %v88_v52 }
  0x47   :  { %3551 = vmatprep.subr.bf16.mxu1 %v3976_v0 }
  0x49   :  { %3212 = vmatmul.mubr.msk.f32.gmra.mrb[6].mxu0 %vm99_vm1, %v89_v53 }
  0x4a   :  { %3244 = vmatprep.mubr.msk.f32.mxu0 %vm3977_vm0, %v3978_v1 }
 0x110   :  { %v3204_v14 = vpop.f32.mrb[0].mxu0 }
 0x111   :  { %v190_v15 = vpop.f32.mrb[1].mxu0  ;;  %v196_v34 = vadd.f32 %v3204_v14, %v4144_v13 }
 0x112   :  { %v191_v16 = vadd.f32 %v4144_v13, %v190_v15 }
 0x114   :  { %v303_v17 = vpop.f32.mrb[0].mxu1  ;;  %v3207_v57 = vpop.f32.mrb[2].mxu0 }
 0x115   :  { %v307_v18 = vadd.f32 %v303_v17, %v191_v16  ;;  %v3224_v19 = vpop.f32.mrb[1].mxu1  ;;  %v200_v58 = vpop.f32.mrb[3].mxu0 }
 0x116   :  { %v201_v2 = vadd.f32 %v4144_v13, %v200_v58 }
 0x117   :  { %3709 = vtanh.f32 %v307_v18  ;;  %v2974_v21 = vmul.f32 -1.442695, %v307_v18 }
 0x118   :  { %v4192_v59 = vpop.f32.mrb[4].mxu0 }
 0x119   :  { %3711 = vpow2.f32 %v2974_v21  ;;  %v4194_v60 = vpop.f32.mrb[5].mxu0 }
 0x11c   :  { %v4196_v61 = vpop.f32.mrb[6].mxu0 }
 0x11d   :  { %v4198_v62 = vpop.f32.mrb[7].mxu0 }
 0x121   :  { %v3710_v20 = vpop.eup %3709 }
 0x122   :  { %317 = vrot.lane.b32.xlu0 %v3710_v20, %s3979_s17 }
 0x123   :  { %v3712_v22 = vpop.eup %3711 }
 0x124   :  { %v311_v23 = vadd.f32 1.0, %v3712_v22 }
 0x126   :  { %3713 = vrcp.f32 %v311_v23  ;;  %v206_v23 = vadd.f32 %v3207_v57, %v4144_v13 }
 0x130   :  { %v3714_v24 = vpop.eup %3713 }
 0x131   :  { %v315_v27 = vmul.f32 0.0, %v3714_v24 }
 0x194   :  { %v318_v25 = vpop.permute.xlu0 %317 }
 0x195   :  { %v320_v26 = vmul.f32 %v3714_v24, %v318_v25 }
 0x197   :  { %322 = vrot.lane.b32.xlu0 %v320_v26, %s3980_s3 }
 0x209   :  { %v323_v28 = vpop.permute.xlu0 %322 }
 0x20a   :  { %v325_v29 = vadd.f32 %v323_v28, %v315_v27 }
 0x20c   :  { %3715 = vtanh.f32 %v325_v29 }
 0x216   :  { %v3716_v30 = vpop.eup %3715 }
 0x217   :  { %328 = vrot.lane.b32.xlu1 %v3716_v30, %s3979_s17 }
 0x289   :  { %v329_v31 = vpop.permute.xlu1 %328 }
 0x28a   :  { %v331_v32 = vmul.f32 %v3714_v24, %v329_v31 }
 0x28c   :  { %333 = vrot.lane.b32.xlu1 %v331_v32, %s3980_s3 }
 0x2fe   :  { %v4151_v33 = vpop.permute.xlu1 %333 }
 0x2ff   :  { %3234 = vmatmul.mubr.msk.f32.vlgmr.msra.gmra.mrb[2].mxu1 %vm233_vm2, %v4151_v33 }
 0x300   :  { %3553 = vmatpush3.bf16.msra.mxu1 %v4110_v8  ;;  %3255 = vmatprep.mubr.msk.f32.mxu1 %vm3977_vm0, %v3978_v1 }
 0x301   :  { %3554 = vmatprep.subr.bf16.mxu1 %v3976_v0 }
 0x304   :  { %3556 = vmatpush3.bf16.msra.mxu1 %v4123_v12 }
 0x305   :  { %3563 = vmatprep.subr.bf16.mxu1 %v3976_v0 }
 0x3d2   :  { %v403_v35 = vpop.f32.mrb[2].mxu1 }
 0x3d3   :  { %v407_v36 = vadd.f32 %v403_v35, %v196_v34  ;;  %v3235_v37 = vpop.f32.mrb[3].mxu1 }
 0x3d5   :  { %3717 = vtanh.f32 %v407_v36  ;;  %v2976_v39 = vmul.f32 -1.442695, %v407_v36 }
 0x3d7   :  { %3719 = vpow2.f32 %v2976_v39 }
 0x3df   :  { %v3718_v38 = vpop.eup %3717 }
 0x3e0   :  { %417 = vrot.lane.b32.xlu0 %v3718_v38, %s3979_s17 }
 0x3e1   :  { %v3720_v40 = vpop.eup %3719 }
 0x3e2   :  { %v411_v41 = vadd.f32 1.0, %v3720_v40 }
 0x3e4   :  { %3721 = vrcp.f32 %v411_v41 }
 0x3ee   :  { %v3722_v42 = vpop.eup %3721 }
 0x3ef   :  { %v415_v45 = vmul.f32 %v3722_v42, %v325_v29 }
 0x452   :  { %v418_v43 = vpop.permute.xlu0 %417 }
 0x453   :  { %v420_v44 = vmul.f32 %v3722_v42, %v418_v43 }
 0x455   :  { %422 = vrot.lane.b32.xlu1 %v420_v44, %s3980_s3 }
 0x4c7   :  { %v423_v46 = vpop.permute.xlu1 %422 }
 0x4c8   :  { %v425_v47 = vadd.f32 %v423_v46, %v415_v45 }
 0x4ca   :  { %3723 = vtanh.f32 %v425_v47 }
 0x4d4   :  { %v3724_v54 = vpop.eup %3723 }
 0x4d5   :  { %428 = vrot.lane.b32.xlu0 %v3724_v54, %s3979_s17 }
 0x547   :  { %v429_v55 = vpop.permute.xlu0 %428 }
 0x548   :  { %v431_v56 = vmul.f32 %v3722_v42, %v429_v55  ;;  %v211_v42 = vadd.f32 %v4144_v13, %v4194_v60 }
 0x54a   :  { %433 = vrot.lane.b32.xlu1 %v431_v56, %s3980_s3 }
 0x5bc   :  { %v4200_v63 = vpop.permute.xlu1 %433 }
 0x5bd   :  { %3245 = vmatmul.mubr.msk.f32.vlgmr.msra.gmra.mrb[8].mxu0 %vm233_vm2, %v4200_v63 }
 0x5be   :  { %3559 = vmatpush3.bf16.msra.mxu0 %v4110_v8  ;;  %3266 = vmatprep.mubr.msk.f32.mxu0 %vm3977_vm0, %v3978_v1 }
 0x5bf   :  { %3560 = vmatprep.subr.bf16.mxu0 %v3976_v0 }
 0x5c2   :  { %3562 = vmatpush3.bf16.msra.mxu0 %v4123_v12 }
 0x5c3   :  { %3569 = vmatprep.subr.bf16.mxu0 %v3976_v0 }
 0x690   :  { %v503_v3 = vpop.f32.mrb[8].mxu0 }
 0x691   :  { %v507_v4 = vadd.f32 %v503_v3, %v201_v2  ;;  %v3246_v5 = vpop.f32.mrb[9].mxu0  ;;  %v216_v2 = vadd.f32 %v4192_v59, %v4144_v13 }
 0x693   :  { %3725 = vtanh.f32 %v507_v4  ;;  %v2978_v7 = vmul.f32 -1.442695, %v507_v4 }
 0x695   :  { %3727 = vpow2.f32 %v2978_v7 }
 0x69d   :  { %v3726_v6 = vpop.eup %3725 }
 0x69e   :  { %517 = vrot.lane.b32.xlu0 %v3726_v6, %s3979_s17 }
 0x69f   :  { %v3728_v9 = vpop.eup %3727 }
 0x6a0   :  { %v511_v10 = vadd.f32 1.0, %v3728_v9 }
 0x6a2   :  { %3729 = vrcp.f32 %v511_v10 }
 0x6ac   :  { %v3730_v11 = vpop.eup %3729 }
 0x6ad   :  { %v515_v16 = vmul.f32 %v3730_v11, %v425_v47 }
 0x710   :  { %v518_v14 = vpop.permute.xlu0 %517 }
 0x711   :  { %v520_v15 = vmul.f32 %v3730_v11, %v518_v14 }
 0x713   :  { %522 = vrot.lane.b32.xlu1 %v520_v15, %s3980_s3 }
 0x785   :  { %v523_v17 = vpop.permute.xlu1 %522 }
 0x786   :  { %v525_v18 = vadd.f32 %v523_v17, %v515_v16  ;;  %v1032_v16 = vld [vmem:[%s4618_s4] sm:$0xff]  ;;  %v1033_v17 = vld [vmem:[%s4618_s4 + $0x8] sm:$0xff] }
 0x788   :  { %3731 = vtanh.f32 %v525_v18 }
 0x792   :  { %v3732_v19 = vpop.eup %3731 }
 0x793   :  { %528 = vrot.lane.b32.xlu0 %v3732_v19, %s3979_s17 }
 0x805   :  { %v529_v20 = vpop.permute.xlu0 %528 }
 0x806   :  { %v531_v21 = vmul.f32 %v3730_v11, %v529_v20 }
 0x808   :  { %533 = vrot.lane.b32.xlu1 %v531_v21, %s3980_s3 }
 0x87a   :  { %v4215_v22 = vpop.permute.xlu1 %533 }
 0x87b   :  { %3256 = vmatmul.mubr.msk.f32.vlgmr.msra.gmra.mrb[4].mxu1 %vm233_vm2, %v4215_v22 }
 0x87c   :  { %3565 = vmatpush3.bf16.msra.mxu1 %v4110_v8  ;;  %3277 = vmatprep.mubr.msk.f32.mxu1 %vm3977_vm0, %v3978_v1 }
 0x87d   :  { %3566 = vmatprep.subr.bf16.mxu1 %v3976_v0 }
 0x880   :  { %3568 = vmatpush3.bf16.msra.mxu1 %v4123_v12 }
 0x881   :  { %3575 = vmatprep.subr.bf16.mxu1 %v3976_v0 }
 0x94e   :  { %v603_v24 = vpop.f32.mrb[4].mxu1 }
 0x94f   :  { %v607_v25 = vadd.f32 %v603_v24, %v206_v23  ;;  %v3257_v26 = vpop.f32.mrb[5].mxu1  ;;  %v1034_v23 = vld [vmem:[%s4618_s4 + $0x10] sm:$0xff]  ;;  %v1035_v24 = vld [vmem:[%s4618_s4 + $0x18] sm:$0xff] }
 0x951   :  { %3733 = vtanh.f32 %v607_v25  ;;  %v2980_v28 = vmul.f32 -1.442695, %v607_v25  ;;  %v3585_v25 = vpack.c.bf16 %v1035_v24, %v1034_v23 }
 0x953   :  { %3735 = vpow2.f32 %v2980_v28 }
 0x95b   :  { %v3734_v27 = vpop.eup %3733 }
 0x95c   :  { %617 = vrot.lane.b32.xlu0 %v3734_v27, %s3979_s17 }
 0x95d   :  { %v3736_v29 = vpop.eup %3735 }
 0x95e   :  { %v611_v30 = vadd.f32 1.0, %v3736_v29 }
 0x960   :  { %3737 = vrcp.f32 %v611_v30 }
 0x96a   :  { %v3738_v31 = vpop.eup %3737 }
 0x96b   :  { %v615_v35 = vmul.f32 %v3738_v31, %v525_v18  ;;  %v3581_v18 = vpack.c.bf16 %v1033_v17, %v1032_v16 }
 0x9ce   :  { %v618_v32 = vpop.permute.xlu0 %617 }
 0x9cf   :  { %v620_v34 = vmul.f32 %v3738_v31, %v618_v32 }
 0x9d1   :  { %622 = vrot.lane.b32.xlu1 %v620_v34, %s3980_s3 }
 0xa43   :  { %v623_v36 = vpop.permute.xlu1 %622 }
 0xa44   :  { %v625_v37 = vadd.f32 %v623_v36, %v615_v35 }
 0xa46   :  { %3739 = vtanh.f32 %v625_v37 }
 0xa50   :  { %v3740_v38 = vpop.eup %3739 }
 0xa51   :  { %628 = vrot.lane.b32.xlu0 %v3740_v38, %s3979_s17 }
 0xac3   :  { %v629_v39 = vpop.permute.xlu0 %628 }
 0xac4   :  { %v631_v40 = vmul.f32 %v3738_v31, %v629_v39 }
 0xac6   :  { %633 = vrot.lane.b32.xlu1 %v631_v40, %s3980_s3 }
 0xb38   :  { %v4230_v41 = vpop.permute.xlu1 %633 }
 0xb39   :  { %3267 = vmatmul.mubr.msk.f32.vlgmr.msra.gmra.mrb[10].mxu0 %vm233_vm2, %v4230_v41 }
 0xb3a   :  { %3571 = vmatpush3.bf16.msra.mxu0 %v4110_v8  ;;  %3288 = vmatprep.mubr.msk.f32.mxu0 %vm3977_vm0, %v3978_v1 }
 0xb3b   :  { %3572 = vmatprep.subr.bf16.mxu0 %v3976_v0 }
 0xb3e   :  { %3574 = vmatpush3.bf16.msra.mxu0 %v4123_v12 }
 0xb3f   :  { %3582 = vmatprep.subr.bf16.mxu0 %v3581_v18 }
 0xc0c   :  { %v703_v43 = vpop.f32.mrb[10].mxu0 }
 0xc0d   :  { %v707_v44 = vadd.f32 %v703_v43, %v211_v42  ;;  %v3268_v45 = vpop.f32.mrb[11].mxu0 }
 0xc0e   :  { %v1153_v45 = vld [vmem:[%s4619_s5] sm:$0xff] }
 0xc0f   :  { %3741 = vtanh.f32 %v707_v44  ;;  %v2982_v47 = vmul.f32 -1.442695, %v707_v44 }
 0xc11   :  { %3743 = vpow2.f32 %v2982_v47 }
 0xc19   :  { %v3742_v46 = vpop.eup %3741 }
 0xc1a   :  { %717 = vrot.lane.b32.xlu0 %v3742_v46, %s3979_s17  ;;  %v1154_v46 = vld [vmem:[%s4619_s5 + $0x8] sm:$0xff] }
 0xc1b   :  { %v3744_v48 = vpop.eup %3743  ;;  %v4306_v47 = vpack.c.bf16 %v1154_v46, %v1153_v45 }
 0xc1c   :  { %v711_v49 = vadd.f32 1.0, %v3744_v48  ;;  %v1155_v48 = vld [vmem:[%s4619_s5 + $0x10] sm:$0xff] }
 0xc1e   :  { %3745 = vrcp.f32 %v711_v49  ;;  %v1156_v49 = vld [vmem:[%s4619_s5 + $0x18] sm:$0xff] }
 0xc28   :  { %v3746_v50 = vpop.eup %3745 }
 0xc29   :  { %v715_v53 = vmul.f32 %v3746_v50, %v625_v37 }
 0xc8c   :  { %v718_v51 = vpop.permute.xlu0 %717 }
 0xc8d   :  { %v720_v52 = vmul.f32 %v3746_v50, %v718_v51 }
 0xc8f   :  { %722 = vrot.lane.b32.xlu1 %v720_v52, %s3980_s3 }
 0xd01   :  { %v723_v54 = vpop.permute.xlu1 %722 }
 0xd02   :  { %v725_v55 = vadd.f32 %v723_v54, %v715_v53  ;;  %v226_v54 = vadd.f32 %v4196_v61, %v4144_v13 }
 0xd04   :  { %3747 = vtanh.f32 %v725_v55 }
 0xd0e   :  { %v3748_v56 = vpop.eup %3747 }
 0xd0f   :  { %728 = vrot.lane.b32.xlu0 %v3748_v56, %s3979_s17 }
 0xd81   :  { %v729_v57 = vpop.permute.xlu0 %728 }
 0xd82   :  { %v731_v58 = vmul.f32 %v3746_v50, %v729_v57  ;;  %v4316_v50 = vpack.c.bf16 %v1156_v49, %v1155_v48 }
 0xd84   :  { %733 = vrot.lane.b32.xlu1 %v731_v58, %s3980_s3  ;;  %v4341_v58 = vld [vmem:[%s4620_s6] ss:$0 sm:$0xff] }
 0xdf6   :  { %v734_v60 = vpop.permute.xlu1 %733 }
 0xdf7   :  { %3278 = vmatmul.mubr.msk.f32.vlgmr.msra.gmra.mrb[6].mxu1 %vm233_vm2, %v734_v60 }
 0xdf8   :  { %3577 = vmatpush3.bf16.msra.mxu1 %v4110_v8  ;;  %3299 = vmatprep.mubr.msk.f32.mxu1 %vm3977_vm0, %v3978_v1 }
 0xdf9   :  { %3578 = vmatprep.subr.bf16.mxu1 %v3976_v0 }
 0xdfc   :  { %3580 = vmatpush3.bf16.msra.mxu1 %v4123_v12 }
 0xdfd   :  { %3589 = vmatprep.subr.bf16.mxu1 %v3976_v0 }
 0xeca   :  { %v803_v3 = vpop.f32.mrb[6].mxu1 }
 0xecb   :  { %v807_v4 = vadd.f32 %v803_v3, %v216_v2  ;;  %v3279_v5 = vpop.f32.mrb[7].mxu1 }
 0xecd   :  { %3749 = vtanh.f32 %v807_v4  ;;  %v2984_v8 = vmul.f32 -1.442695, %v807_v4 }
 0xecf   :  { %3751 = vpow2.f32 %v2984_v8 }
 0xed7   :  { %v3750_v6 = vpop.eup %3749 }
 0xed8   :  { %817 = vrot.lane.b32.xlu0 %v3750_v6, %s3979_s17 }
 0xed9   :  { %v3752_v7 = vpop.eup %3751 }
 0xeda   :  { %v811_v9 = vadd.f32 1.0, %v3752_v7 }
 0xedc   :  { %3753 = vrcp.f32 %v811_v9 }
 0xee6   :  { %v3754_v10 = vpop.eup %3753 }
 0xee7   :  { %v815_v14 = vmul.f32 %v3754_v10, %v725_v55 }
 0xf4a   :  { %v818_v11 = vpop.permute.xlu0 %817 }
 0xf4b   :  { %v820_v12 = vmul.f32 %v3754_v10, %v818_v11 }
 0xf4d   :  { %822 = vrot.lane.b32.xlu1 %v820_v12, %s3980_s3 }
 0xfbf   :  { %v823_v15 = vpop.permute.xlu1 %822 }
 0xfc0   :  { %v825_v59 = vadd.f32 %v823_v15, %v815_v14 }
 0xfc2   :  { %3755 = vtanh.f32 %v825_v59 }
 0xfcc   :  { %v3756_v19 = vpop.eup %3755 }
 0xfcd   :  { %828 = vrot.lane.b32.xlu0 %v3756_v19, %s3979_s17 }
0x103f   :  { %v829_v20 = vpop.permute.xlu0 %828 }
0x1040   :  { %v831_v21 = vmul.f32 %v3754_v10, %v829_v20 }
0x1042   :  { %833 = vrot.lane.b32.xlu1 %v831_v21, %s3980_s3 }
0x10b4   :  { %v834_v26 = vpop.permute.xlu1 %833 }
0x10b5   :  { %3289 = vmatmul.mubr.msk.f32.vlgmr.msra.gmra.mrb[12].mxu0 %vm233_vm2, %v834_v26 }
0x10b6   :  { %3584 = vmatpush3.bf16.msra.mxu0 %v3581_v18  ;;  %3310 = vmatprep.mubr.msk.f32.mxu0 %vm233_vm2, %v4151_v33  ;;  %v221_v33 = vadd.f32 %v4144_v13, %v4198_v62 }
0x10b7   :  { %3586 = vmatprep.subr.bf16.mxu0 %v3585_v25 }
0x10ba   :  { %3588 = vmatpush3.bf16.msra.mxu0 %v3585_v25 }
0x10bb   :  { %3601 = vmatprep.subr.bf16.mxu0 %v3976_v0 }
0x10bd   :  { %3311 = vmatmul.mubr.msk.f32.vlgmr.msra.gmra.mrb[14].mxu0 %vm233_vm2, %v4200_v63 }
0x10be   :  { %3313 = vmatprep.mubr.msk.f32.mxu0 %vm233_vm2, %v4215_v22  ;;  %3603 = vmatpush3.bf16.msra.mxu0 %v4306_v47 }
0x10bf   :  { %3604 = vmatprep.subr.bf16.mxu0 %v3976_v0 }
0x10c1   :  { %3314 = vmatmul.mubr.msk.f32.gmra.mrb[16].mxu0 %vm233_vm2, %v4230_v41 }
0x10c2   :  { %3316 = vmatprep.mubr.msk.f32.mxu0 %vm233_vm2, %v734_v60  ;;  %3606 = vmatpush3.bf16.msra.mxu0 %v4316_v50 }
0x10c3   :  { %3613 = vmatprep.subr.bf16.mxu0 %v3976_v0 }
0x10c5   :  { %3317 = vmatmul.mubr.msk.f32.gmra.mrb[18].mxu0 %vm233_vm2, %v834_v26 }
0x1188   :  { %v903_v27 = vpop.f32.mrb[12].mxu0 }
0x1189   :  { %v907_v28 = vadd.f32 %v903_v27, %v221_v33  ;;  %v3290_v29 = vpop.f32.mrb[13].mxu0 }
0x118b   :  { %3757 = vtanh.f32 %v907_v28  ;;  %v2986_v36 = vmul.f32 -1.442695, %v907_v28 }
0x118d   :  { %3759 = vpow2.f32 %v2986_v36 }
0x1190   :  { %v4284_v30 = vpop.f32.mrb[14].mxu0 }
0x1191   :  { %v1114_v63 = vpop.f32.mrb[15].mxu0 }
0x1192   :  { %v1115_v60 = vadd.f32 %v4341_v58, %v1114_v63  ;;  %v1120_v63 = vadd.f32 %v4284_v30, %v4341_v58 }
0x1194   :  { %v4286_v31 = vpop.f32.mrb[16].mxu0 }
0x1195   :  { %v3758_v22 = vpop.eup %3757  ;;  %v4288_v32 = vpop.f32.mrb[17].mxu0 }
0x1196   :  { %917 = vrot.lane.b32.xlu0 %v3758_v22, %s3979_s17 }
0x1197   :  { %v3760_v62 = vpop.eup %3759 }
0x1198   :  { %v4291_v34 = vpop.f32.mrb[18].mxu0  ;;  %v911_v37 = vadd.f32 1.0, %v3760_v62 }
0x1199   :  { %v4293_v35 = vpop.f32.mrb[19].mxu0 }
0x119a   :  { %3761 = vrcp.f32 %v911_v37 }
0x11a4   :  { %v3762_v38 = vpop.eup %3761 }
0x11a5   :  { %v915_v41 = vmul.f32 %v3762_v38, %v825_v59 }
0x1208   :  { %v918_v39 = vpop.permute.xlu0 %917 }
0x1209   :  { %v920_v40 = vmul.f32 %v3762_v38, %v918_v39 }
0x120b   :  { %922 = vrot.lane.b32.xlu1 %v920_v40, %s3980_s3 }
0x127d   :  { %v923_v42 = vpop.permute.xlu1 %922 }
0x127e   :  { %v4296_v43 = vadd.f32 %v923_v42, %v915_v41 }
0x1280   :  { %3763 = vtanh.f32 %v4296_v43 }
0x128a   :  { %v3764_v44 = vpop.eup %3763 }
0x128b   :  { %928 = vrot.lane.b32.xlu0 %v3764_v44, %s3979_s17 }
0x12fd   :  { %v929_v51 = vpop.permute.xlu0 %928 }
0x12fe   :  { %v931_v52 = vmul.f32 %v3762_v38, %v929_v51 }
0x1300   :  { %933 = vrot.lane.b32.xlu1 %v931_v52, %s3980_s3 }
0x1372   :  { %v934_v53 = vpop.permute.xlu1 %933 }
0x1373   :  { %3300 = vmatmul.mubr.msk.f32.vlgmr.msra.gmra.mrb[8].mxu1 %vm233_vm2, %v934_v53  ;;  %3319 = vmatprep.mubr.msk.f32.mxu0 %vm233_vm2, %v934_v53 }
0x1374   :  { %3591 = vmatpush3.bf16.msra.mxu1 %v4306_v47  ;;  %3330 = vmatprep.mubr.msk.f32.mxu1 %vm3977_vm0, %v3978_v1 }
0x1375   :  { %3592 = vmatprep.subr.bf16.mxu1 %v3976_v0 }
0x1378   :  { %3594 = vmatpush3.bf16.msra.mxu1 %v4316_v50 }
0x1379   :  { %3595 = vmatprep.subr.bf16.mxu1 %v3976_v0 }
0x137b   :  { %3331 = vmatmul.mubr.f32.vlgmr.msra.gmra.mrb[10].mxu1 %v3978_v1 }
0x137c   :  { %3597 = vmatpush3.bf16.msra.mxu1 %v4306_v47  ;;  %3341 = vmatprep.mubr.msk.f32.mxu1 %vm3977_vm0, %v3978_v1 }
0x137d   :  { %3598 = vmatprep.subr.bf16.mxu1 %v3976_v0 }
0x1380   :  { %3600 = vmatpush3.bf16.msra.mxu1 %v4316_v50 }
0x1381   :  { %3607 = vmatprep.subr.bf16.mxu1 %v3976_v0 }
0x1446   :  { %v1003_v55 = vpop.f32.mrb[8].mxu1 }
0x1447   :  { %v1007_v56 = vadd.f32 %v1003_v55, %v226_v54  ;;  %v3301_v57 = vpop.f32.mrb[9].mxu1  ;;  %v1125_v55 = vadd.f32 %v4341_v58, %v4288_v32 }
0x1449   :  { %v2988_v59 = vmul.f32 -1.442695, %v1007_v56 }
0x144e   :  { %v1223_v2 = vpop.f32.mrb[10].mxu1 }
0x144f   :  { %v1227_v3 = vadd.f32 %v1223_v2, %v1115_v60  ;;  %v3332_v4 = vpop.f32.mrb[11].mxu1 }
0x1451   :  { %3765 = vtanh.f32 %v1227_v3  ;;  %v2998_v6 = vmul.f32 -1.442695, %v1227_v3 }
0x1453   :  { %3767 = vpow2.f32 %v2998_v6 }
0x145b   :  { %v3766_v5 = vpop.eup %3765 }
0x145c   :  { %1237 = vrot.lane.b32.xlu0 %v3766_v5, %s3979_s17 }
0x145d   :  { %v3768_v13 = vpop.eup %3767 }
0x145e   :  { %v1231_v61 = vadd.f32 1.0, %v3768_v13 }
0x1460   :  { %3769 = vrcp.f32 %v1231_v61 }
0x146a   :  { %v3770_v8 = vpop.eup %3769 }
0x146b   :  { %v1235_v10 = vmul.f32 0.0, %v3770_v8 }
0x14ce   :  { %v1238_v7 = vpop.permute.xlu0 %1237 }
0x14cf   :  { %v1240_v9 = vmul.f32 %v3770_v8, %v1238_v7 }
0x14d1   :  { %1242 = vrot.lane.b32.xlu1 %v1240_v9, %s3980_s3 }
0x1543   :  { %v1243_v11 = vpop.permute.xlu1 %1242 }
0x1544   :  { %v1245_v12 = vadd.f32 %v1243_v11, %v1235_v10 }
0x1546   :  { %3771 = vtanh.f32 %v1245_v12 }
0x1547   :  { %3773 = vtanh.f32 %v1007_v56 }
0x1548   :  { %3775 = vpow2.f32 %v2988_v59 }
0x1550   :  { %v3772_v14 = vpop.eup %3771 }
0x1551   :  { %1248 = vrot.lane.b32.xlu0 %v3772_v14, %s3979_s17  ;;  %v3774_v15 = vpop.eup %3773  ;;  %v1130_v14 = vadd.f32 %v4286_v31, %v4341_v58 }
0x1552   :  { %v3776_v16 = vpop.eup %3775 }
0x1553   :  { %v1011_v17 = vadd.f32 1.0, %v3776_v16 }
0x1555   :  { %1017 = vrot.lane.b32.xlu0 %v3774_v15, %s3979_s17  ;;  %3777 = vrcp.f32 %v1011_v17 }
0x155f   :  { %v3778_v20 = vpop.eup %3777 }
0x1560   :  { %v1015_v25 = vmul.f32 %v3778_v20, %v4296_v43 }
0x15c3   :  { %v1249_v18 = vpop.permute.xlu0 %1248 }
0x15c4   :  { %v1251_v19 = vmul.f32 %v3770_v8, %v1249_v18 }
0x15c6   :  { %1253 = vrot.lane.b32.xlu1 %v1251_v19, %s3980_s3 }
0x15c7   :  { %v1018_v21 = vpop.permute.xlu0 %1017 }
0x15c8   :  { %v1020_v23 = vmul.f32 %v3778_v20, %v1018_v21 }
0x15ca   :  { %1022 = vrot.lane.b32.xlu0 %v1020_v23, %s3980_s3 }
0x1638   :  { %v4350_v24 = vpop.permute.xlu1 %1253 }
0x1639   :  { %3342 = vmatmul.mubr.msk.f32.vlgmr.msra.gmra.mrb[12].mxu1 %vm233_vm2, %v4350_v24 }
0x163a   :  { %3609 = vmatpush3.bf16.msra.mxu1 %v4306_v47  ;;  %3363 = vmatprep.mubr.msk.f32.mxu1 %vm3977_vm0, %v3978_v1 }
0x163b   :  { %3610 = vmatprep.subr.bf16.mxu1 %v3976_v0 }
0x163c   :  { %v1023_v26 = vpop.permute.xlu0 %1022 }
0x163d   :  { %v1025_v33 = vadd.f32 %v1023_v26, %v1015_v25 }
0x163e   :  { %3612 = vmatpush3.bf16.msra.mxu1 %v4316_v50 }
0x163f   :  { %3779 = vtanh.f32 %v1025_v33  ;;  %3619 = vmatprep.subr.bf16.mxu1 %v3976_v0 }
0x1649   :  { %v3780_v27 = vpop.eup %3779 }
0x164a   :  { %1028 = vrot.lane.b32.xlu0 %v3780_v27, %s3979_s17 }
0x16bc   :  { %v1029_v28 = vpop.permute.xlu0 %1028 }
0x16bd   :  { %v1031_v29 = vmul.f32 %v3778_v20, %v1029_v28 }
0x16bf   :  { %1044 = vrot.lane.b32.xlu0 %v1031_v29, %s3980_s3 }
0x170c   :  { %v1323_v22 = vpop.f32.mrb[12].mxu1 }
0x170d   :  { %v1327_v36 = vadd.f32 %v1323_v22, %v1120_v63  ;;  %v3343_v62 = vpop.f32.mrb[13].mxu1  ;;  %v1135_v22 = vadd.f32 %v4341_v58, %v4293_v35 }
0x170f   :  { %3781 = vtanh.f32 %v1327_v36  ;;  %v3000_v39 = vmul.f32 -1.442695, %v1327_v36 }
0x1711   :  { %3783 = vpow2.f32 %v3000_v39 }
0x1719   :  { %v3782_v37 = vpop.eup %3781 }
0x171a   :  { %1337 = vrot.lane.b32.xlu1 %v3782_v37, %s3979_s17 }
0x171b   :  { %v3784_v40 = vpop.eup %3783 }
0x171c   :  { %v1331_v41 = vadd.f32 1.0, %v3784_v40 }
0x171e   :  { %3785 = vrcp.f32 %v1331_v41 }
0x1728   :  { %v3786_v42 = vpop.eup %3785 }
0x1729   :  { %v1335_v44 = vmul.f32 %v3786_v42, %v1245_v12 }
0x1731   :  { %v1045_v38 = vpop.permute.xlu0 %1044 }
0x1732   :  { %3320 = vmatmul.mubr.msk.f32.gmra.mrb[20].mxu0 %vm233_vm2, %v1045_v38 }
0x1733   :  { %3352 = vmatprep.mubr.msk.f32.mxu0 %vm3977_vm0, %v3978_v1 }
0x178c   :  { %v1338_v30 = vpop.permute.xlu1 %1337 }
0x178d   :  { %v1340_v43 = vmul.f32 %v3786_v42, %v1338_v30 }
0x178f   :  { %1342 = vrot.lane.b32.xlu1 %v1340_v43, %s3980_s3 }
0x1801   :  { %v1343_v45 = vpop.permute.xlu1 %1342 }
0x1802   :  { %v1345_v46 = vadd.f32 %v1343_v45, %v1335_v44 }
0x1804   :  { %3787 = vtanh.f32 %v1345_v46 }
0x1805   :  { %v4370_v48 = vpop.f32.mrb[20].mxu0 }
0x1806   :  { %v4372_v49 = vpop.f32.mrb[21].mxu0 }
0x180e   :  { %v3788_v51 = vpop.eup %3787 }
0x180f   :  { %1348 = vrot.lane.b32.xlu1 %v3788_v51, %s3979_s17 }
0x1881   :  { %v1349_v52 = vpop.permute.xlu1 %1348 }
0x1882   :  { %v1351_v53 = vmul.f32 %v3786_v42, %v1349_v52 }
0x1884   :  { %1353 = vrot.lane.b32.xlu1 %v1351_v53, %s3980_s3 }
0x18f6   :  { %v4376_v54 = vpop.permute.xlu1 %1353 }
0x18f7   :  { %3353 = vmatmul.mubr.msk.f32.vlgmr.msra.gmra.mrb[22].mxu0 %vm233_vm2, %v4376_v54 }
0x18f8   :  { %3615 = vmatpush3.bf16.msra.mxu0 %v4306_v47  ;;  %3374 = vmatprep.mubr.msk.f32.mxu0 %vm3977_vm0, %v3978_v1 }
0x18f9   :  { %3616 = vmatprep.subr.bf16.mxu0 %v3976_v0 }
0x18fc   :  { %3618 = vmatpush3.bf16.msra.mxu0 %v4316_v50 }
0x18fd   :  { %3625 = vmatprep.subr.bf16.mxu0 %v3976_v0 }
0x19ca   :  { %v1423_v56 = vpop.f32.mrb[22].mxu0 }
0x19cb   :  { %v1427_v57 = vadd.f32 %v1423_v56, %v1125_v55  ;;  %v3354_v60 = vpop.f32.mrb[23].mxu0  ;;  %v1140_v55 = vadd.f32 %v4291_v34, %v4341_v58 }
0x19cd   :  { %3789 = vtanh.f32 %v1427_v57  ;;  %v3002_v3 = vmul.f32 -1.442695, %v1427_v57 }
0x19cf   :  { %3791 = vpow2.f32 %v3002_v3 }
0x19d7   :  { %v3790_v2 = vpop.eup %3789 }
0x19d8   :  { %1437 = vrot.lane.b32.xlu0 %v3790_v2, %s3979_s17 }
0x19d9   :  { %v3792_v4 = vpop.eup %3791 }
0x19da   :  { %v1431_v5 = vadd.f32 1.0, %v3792_v4 }
0x19dc   :  { %3793 = vrcp.f32 %v1431_v5 }
0x19e6   :  { %v3794_v6 = vpop.eup %3793 }
0x19e7   :  { %v1435_v8 = vmul.f32 %v3794_v6, %v1345_v46 }
0x1a4a   :  { %v1438_v13 = vpop.permute.xlu0 %1437 }
0x1a4b   :  { %v1440_v61 = vmul.f32 %v3794_v6, %v1438_v13 }
0x1a4d   :  { %1442 = vrot.lane.b32.xlu1 %v1440_v61, %s3980_s3 }
0x1abf   :  { %v1443_v7 = vpop.permute.xlu1 %1442 }
0x1ac0   :  { %v1445_v32 = vadd.f32 %v1443_v7, %v1435_v8  ;;  %v1952_v8 = vld [vmem:[%s4621_s7] sm:$0xff]  ;;  %v1953_v7 = vld [vmem:[%s4621_s7 + $0x8] sm:$0xff] }
0x1ac2   :  { %3795 = vtanh.f32 %v1445_v32 }
0x1acc   :  { %v3796_v9 = vpop.eup %3795 }
0x1acd   :  { %1448 = vrot.lane.b32.xlu0 %v3796_v9, %s3979_s17 }
0x1b3f   :  { %v1449_v10 = vpop.permute.xlu0 %1448 }
0x1b40   :  { %v1451_v11 = vmul.f32 %v3794_v6, %v1449_v10 }
0x1b42   :  { %1453 = vrot.lane.b32.xlu1 %v1451_v11, %s3980_s3 }
0x1bb4   :  { %v4392_v12 = vpop.permute.xlu1 %1453 }
0x1bb5   :  { %3364 = vmatmul.mubr.msk.f32.vlgmr.msra.gmra.mrb[14].mxu1 %vm233_vm2, %v4392_v12 }
0x1bb6   :  { %3621 = vmatpush3.bf16.msra.mxu1 %v4306_v47  ;;  %3385 = vmatprep.mubr.msk.f32.mxu1 %vm3977_vm0, %v3978_v1 }
0x1bb7   :  { %3622 = vmatprep.subr.bf16.mxu1 %v3976_v0 }
0x1bba   :  { %3624 = vmatpush3.bf16.msra.mxu1 %v4316_v50 }
0x1bbb   :  { %3631 = vmatprep.subr.bf16.mxu1 %v3976_v0 }
0x1c88   :  { %v1523_v15 = vpop.f32.mrb[14].mxu1 }
0x1c89   :  { %v1527_v59 = vadd.f32 %v1523_v15, %v1130_v14  ;;  %v3365_v16 = vpop.f32.mrb[15].mxu1  ;;  %v1954_v14 = vld [vmem:[%s4621_s7 + $0x10] sm:$0xff]  ;;  %v1955_v15 = vld [vmem:[%s4621_s7 + $0x18] sm:$0xff] }
0x1c8b   :  { %3797 = vtanh.f32 %v1527_v59  ;;  %v3004_v18 = vmul.f32 -1.442695, %v1527_v59  ;;  %v3641_v59 = vpack.c.bf16 %v1955_v15, %v1954_v14 }
0x1c8d   :  { %3799 = vpow2.f32 %v3004_v18 }
0x1c95   :  { %v3798_v17 = vpop.eup %3797 }
0x1c96   :  { %1537 = vrot.lane.b32.xlu0 %v3798_v17, %s3979_s17 }
0x1c97   :  { %v3800_v19 = vpop.eup %3799 }
0x1c98   :  { %v1531_v20 = vadd.f32 1.0, %v3800_v19 }
0x1c9a   :  { %3801 = vrcp.f32 %v1531_v20 }
0x1ca4   :  { %v3802_v21 = vpop.eup %3801 }
0x1ca5   :  { %v1535_v26 = vmul.f32 %v3802_v21, %v1445_v32  ;;  %v3637_v32 = vpack.c.bf16 %v1953_v7, %v1952_v8 }
0x1d08   :  { %v1538_v23 = vpop.permute.xlu0 %1537 }
0x1d09   :  { %v1540_v25 = vmul.f32 %v3802_v21, %v1538_v23 }
0x1d0b   :  { %1542 = vrot.lane.b32.xlu1 %v1540_v25, %s3980_s3 }
0x1d7d   :  { %v1543_v33 = vpop.permute.xlu1 %1542 }
0x1d7e   :  { %v1545_v31 = vadd.f32 %v1543_v33, %v1535_v26 }
0x1d80   :  { %3803 = vtanh.f32 %v1545_v31 }
0x1d8a   :  { %v3804_v27 = vpop.eup %3803 }
0x1d8b   :  { %1548 = vrot.lane.b32.xlu0 %v3804_v27, %s3979_s17 }
0x1dfd   :  { %v1549_v28 = vpop.permute.xlu0 %1548 }
0x1dfe   :  { %v1551_v29 = vmul.f32 %v3802_v21, %v1549_v28 }
0x1e00   :  { %1553 = vrot.lane.b32.xlu1 %v1551_v29, %s3980_s3 }
0x1e72   :  { %v4408_v63 = vpop.permute.xlu1 %1553 }
0x1e73   :  { %3375 = vmatmul.mubr.msk.f32.vlgmr.msra.gmra.mrb[24].mxu0 %vm233_vm2, %v4408_v63 }
0x1e74   :  { %3627 = vmatpush3.bf16.msra.mxu0 %v4306_v47  ;;  %3396 = vmatprep.mubr.msk.f32.mxu0 %vm3977_vm0, %v3978_v1 }
0x1e75   :  { %3628 = vmatprep.subr.bf16.mxu0 %v3976_v0 }
0x1e78   :  { %3630 = vmatpush3.bf16.msra.mxu0 %v4316_v50 }
0x1e79   :  { %3638 = vmatprep.subr.bf16.mxu0 %v3637_v32 }
0x1f46   :  { %v1623_v36 = vpop.f32.mrb[24].mxu0 }
0x1f47   :  { %v1627_v62 = vadd.f32 %v1623_v36, %v1135_v22  ;;  %v3376_v37 = vpop.f32.mrb[25].mxu0 }
0x1f48   :  { %v2073_v37 = vld [vmem:[#allocation4] sm:$0xff] }
0x1f49   :  { %3805 = vtanh.f32 %v1627_v62  ;;  %v3006_v39 = vmul.f32 -1.442695, %v1627_v62 }
0x1f4b   :  { %3807 = vpow2.f32 %v3006_v39 }
0x1f53   :  { %v3806_v38 = vpop.eup %3805 }
0x1f54   :  { %1637 = vrot.lane.b32.xlu0 %v3806_v38, %s3979_s17  ;;  %v2074_v38 = vld [vmem:[#allocation4 + $0x8] sm:$0xff] }
0x1f55   :  { %v3808_v40 = vpop.eup %3807  ;;  %v4478_v39 = vpack.c.bf16 %v2074_v38, %v2073_v37 }
0x1f56   :  { %v1631_v41 = vadd.f32 1.0, %v3808_v40  ;;  %v2075_v40 = vld [vmem:[#allocation4 + $0x10] sm:$0xff] }
0x1f58   :  { %3809 = vrcp.f32 %v1631_v41  ;;  %v2076_v41 = vld [vmem:[#allocation4 + $0x18] sm:$0xff] }
0x1f62   :  { %v3810_v42 = vpop.eup %3809 }
0x1f63   :  { %v1635_v44 = vmul.f32 %v3810_v42, %v1545_v31 }
0x1fc6   :  { %v1638_v30 = vpop.permute.xlu0 %1637 }
0x1fc7   :  { %v1640_v43 = vmul.f32 %v3810_v42, %v1638_v30 }
0x1fc9   :  { %1642 = vrot.lane.b32.xlu1 %v1640_v43, %s3980_s3 }
0x203b   :  { %v1643_v45 = vpop.permute.xlu1 %1642 }
0x203c   :  { %v1645_v35 = vadd.f32 %v1643_v45, %v1635_v44  ;;  %v1150_v45 = vadd.f32 %v4370_v48, %v4341_v58 }
0x203e   :  { %3811 = vtanh.f32 %v1645_v35 }
0x2048   :  { %v3812_v46 = vpop.eup %3811 }
0x2049   :  { %1648 = vrot.lane.b32.xlu0 %v3812_v46, %s3979_s17 }
0x20bb   :  { %v1649_v51 = vpop.permute.xlu0 %1648 }
0x20bc   :  { %v1651_v52 = vmul.f32 %v3810_v42, %v1649_v51  ;;  %v4482_v42 = vpack.c.bf16 %v2076_v41, %v2075_v40 }
0x20be   :  { %1653 = vrot.lane.b32.xlu1 %v1651_v52, %s3980_s3  ;;  %v4507_v52 = vld [vmem:[%s4623_s9] ss:$0 sm:$0xff] }
0x2130   :  { %v1654_v53 = vpop.permute.xlu1 %1653 }
0x2131   :  { %3386 = vmatmul.mubr.msk.f32.vlgmr.msra.gmra.mrb[16].mxu1 %vm233_vm2, %v1654_v53 }
0x2132   :  { %3633 = vmatpush3.bf16.msra.mxu1 %v4306_v47  ;;  %3407 = vmatprep.mubr.msk.f32.mxu1 %vm3977_vm0, %v3978_v1 }
0x2133   :  { %3634 = vmatprep.subr.bf16.mxu1 %v3976_v0 }
0x2136   :  { %3636 = vmatpush3.bf16.msra.mxu1 %v4316_v50 }
0x2137   :  { %3645 = vmatprep.subr.bf16.mxu1 %v3976_v0 }
0x2204   :  { %v1723_v56 = vpop.f32.mrb[16].mxu1 }
0x2205   :  { %v1727_v57 = vadd.f32 %v1723_v56, %v1140_v55  ;;  %v3387_v60 = vpop.f32.mrb[17].mxu1 }
0x2207   :  { %3813 = vtanh.f32 %v1727_v57  ;;  %v3008_v47 = vmul.f32 -1.442695, %v1727_v57 }
0x2209   :  { %3815 = vpow2.f32 %v3008_v47 }
0x2211   :  { %v3814_v2 = vpop.eup %3813 }
0x2212   :  { %1737 = vrot.lane.b32.xlu0 %v3814_v2, %s3979_s17 }
0x2213   :  { %v3816_v3 = vpop.eup %3815 }
0x2214   :  { %v1731_v4 = vadd.f32 1.0, %v3816_v3 }
0x2216   :  { %3817 = vrcp.f32 %v1731_v4 }
0x2220   :  { %v3818_v5 = vpop.eup %3817 }
0x2221   :  { %v1735_v13 = vmul.f32 %v3818_v5, %v1645_v35 }
0x2284   :  { %v1738_v6 = vpop.permute.xlu0 %1737 }
0x2285   :  { %v1740_v50 = vmul.f32 %v3818_v5, %v1738_v6 }
0x2287   :  { %1742 = vrot.lane.b32.xlu1 %v1740_v50, %s3980_s3 }
0x22f9   :  { %v1743_v61 = vpop.permute.xlu1 %1742 }
0x22fa   :  { %v1745_v34 = vadd.f32 %v1743_v61, %v1735_v13 }
0x22fc   :  { %3819 = vtanh.f32 %v1745_v34 }
0x2306   :  { %v3820_v9 = vpop.eup %3819 }
0x2307   :  { %1748 = vrot.lane.b32.xlu0 %v3820_v9, %s3979_s17 }
0x2379   :  { %v1749_v10 = vpop.permute.xlu0 %1748 }
0x237a   :  { %v1751_v11 = vmul.f32 %v3818_v5, %v1749_v10 }
0x237c   :  { %1753 = vrot.lane.b32.xlu1 %v1751_v11, %s3980_s3 }
0x23ee   :  { %v1754_v16 = vpop.permute.xlu1 %1753 }
0x23ef   :  { %3397 = vmatmul.mubr.msk.f32.vlgmr.msra.gmra.mrb[26].mxu0 %vm233_vm2, %v1754_v16 }
0x23f0   :  { %3640 = vmatpush3.bf16.msra.mxu0 %v3637_v32  ;;  %3418 = vmatprep.mubr.msk.f32.mxu0 %vm233_vm2, %v4350_v24  ;;  %v1145_v24 = vadd.f32 %v4341_v58, %v4372_v49 }
0x23f1   :  { %3642 = vmatprep.subr.bf16.mxu0 %v3641_v59 }
0x23f4   :  { %3644 = vmatpush3.bf16.msra.mxu0 %v3641_v59 }
0x23f5   :  { %3657 = vmatprep.subr.bf16.mxu0 %v3976_v0 }
0x23f7   :  { %3419 = vmatmul.mubr.msk.f32.vlgmr.msra.gmra.mrb[28].mxu0 %vm233_vm2, %v4376_v54 }
0x23f8   :  { %3421 = vmatprep.mubr.msk.f32.mxu0 %vm233_vm2, %v4392_v12  ;;  %3659 = vmatpush3.bf16.msra.mxu0 %v4478_v39 }
0x23f9   :  { %3660 = vmatprep.subr.bf16.mxu0 %v3976_v0 }
0x23fb   :  { %3422 = vmatmul.mubr.msk.f32.gmra.mrb[30].mxu0 %vm233_vm2, %v4408_v63 }
0x23fc   :  { %3424 = vmatprep.mubr.msk.f32.mxu0 %vm233_vm2, %v1654_v53  ;;  %3662 = vmatpush3.bf16.msra.mxu0 %v4482_v42 }
0x23fd   :  { %3669 = vmatprep.subr.bf16.mxu0 %v3976_v0 }
0x23ff   :  { %3425 = vmatmul.mubr.msk.f32.gmra.mrb[32].mxu0 %vm233_vm2, %v1754_v16 }
0x24c2   :  { %v1823_v17 = vpop.f32.mrb[26].mxu0 }
0x24c3   :  { %v1827_v18 = vadd.f32 %v1823_v17, %v1145_v24  ;;  %v3398_v19 = vpop.f32.mrb[27].mxu0 }
0x24c5   :  { %3821 = vtanh.f32 %v1827_v18  ;;  %v3010_v33 = vmul.f32 -1.442695, %v1827_v18 }
0x24c7   :  { %3823 = vpow2.f32 %v3010_v33 }
0x24ca   :  { %v4462_v20 = vpop.f32.mrb[28].mxu0 }
0x24cb   :  { %v2034_v54 = vpop.f32.mrb[29].mxu0 }
0x24cc   :  { %v2035_v53 = vadd.f32 %v4507_v52, %v2034_v54  ;;  %v2040_v54 = vadd.f32 %v4462_v20, %v4507_v52 }
0x24ce   :  { %v4464_v21 = vpop.f32.mrb[30].mxu0 }
0x24cf   :  { %v3822_v12 = vpop.eup %3821  ;;  %v4466_v23 = vpop.f32.mrb[31].mxu0 }
0x24d0   :  { %1837 = vrot.lane.b32.xlu0 %v3822_v12, %s3979_s17 }
0x24d1   :  { %v3824_v49 = vpop.eup %3823 }
0x24d2   :  { %v4469_v25 = vpop.f32.mrb[32].mxu0  ;;  %v1831_v31 = vadd.f32 1.0, %v3824_v49 }
0x24d3   :  { %v4471_v26 = vpop.f32.mrb[33].mxu0 }
0x24d4   :  { %3825 = vrcp.f32 %v1831_v31 }
0x24de   :  { %v3826_v27 = vpop.eup %3825 }
0x24df   :  { %v1835_v63 = vmul.f32 %v3826_v27, %v1745_v34 }
0x2542   :  { %v1838_v28 = vpop.permute.xlu0 %1837 }
0x2543   :  { %v1840_v29 = vmul.f32 %v3826_v27, %v1838_v28 }
0x2545   :  { %1842 = vrot.lane.b32.xlu1 %v1840_v29, %s3980_s3 }
0x25b7   :  { %v1843_v22 = vpop.permute.xlu1 %1842 }
0x25b8   :  { %v4474_v36 = vadd.f32 %v1843_v22, %v1835_v63 }
0x25ba   :  { %3827 = vtanh.f32 %v4474_v36 }
0x25c4   :  { %v3828_v62 = vpop.eup %3827 }
0x25c5   :  { %1848 = vrot.lane.b32.xlu0 %v3828_v62, %s3979_s17 }
0x2637   :  { %v1849_v30 = vpop.permute.xlu0 %1848 }
0x2638   :  { %v1851_v43 = vmul.f32 %v3826_v27, %v1849_v30 }
0x263a   :  { %1853 = vrot.lane.b32.xlu1 %v1851_v43, %s3980_s3 }
0x26ac   :  { %v1854_v44 = vpop.permute.xlu1 %1853 }
0x26ad   :  { %3408 = vmatmul.mubr.msk.f32.vlgmr.msra.gmra.mrb[18].mxu1 %vm233_vm2, %v1854_v44  ;;  %3427 = vmatprep.mubr.msk.f32.mxu0 %vm233_vm2, %v1854_v44 }
0x26ae   :  { %3647 = vmatpush3.bf16.msra.mxu1 %v4478_v39  ;;  %3438 = vmatprep.mubr.msk.f32.mxu1 %vm3977_vm0, %v3978_v1 }
0x26af   :  { %3648 = vmatprep.subr.bf16.mxu1 %v3976_v0 }
0x26b2   :  { %3650 = vmatpush3.bf16.msra.mxu1 %v4482_v42 }
0x26b3   :  { %3651 = vmatprep.subr.bf16.mxu1 %v3976_v0 }
0x26b5   :  { %3439 = vmatmul.mubr.f32.vlgmr.msra.gmra.mrb[20].mxu1 %v3978_v1 }
0x26b6   :  { %3653 = vmatpush3.bf16.msra.mxu1 %v4478_v39  ;;  %3449 = vmatprep.mubr.msk.f32.mxu1 %vm3977_vm0, %v3978_v1 }
0x26b7   :  { %3654 = vmatprep.subr.bf16.mxu1 %v3976_v0 }
0x26ba   :  { %3656 = vmatpush3.bf16.msra.mxu1 %v4482_v42 }
0x26bb   :  { %3663 = vmatprep.subr.bf16.mxu1 %v3976_v0 }
0x2780   :  { %v1923_v35 = vpop.f32.mrb[18].mxu1 }
0x2781   :  { %v1927_v46 = vadd.f32 %v1923_v35, %v1150_v45  ;;  %v3409_v51 = vpop.f32.mrb[19].mxu1  ;;  %v2045_v35 = vadd.f32 %v4507_v52, %v4466_v23 }
0x2783   :  { %v3012_v34 = vmul.f32 -1.442695, %v1927_v46 }
0x2788   :  { %v2143_v55 = vpop.f32.mrb[20].mxu1 }
0x2789   :  { %v2147_v56 = vadd.f32 %v2143_v55, %v2035_v53  ;;  %v3440_v57 = vpop.f32.mrb[21].mxu1 }
0x278b   :  { %3829 = vtanh.f32 %v2147_v56  ;;  %v3022_v2 = vmul.f32 -1.442695, %v2147_v56 }
0x278d   :  { %3831 = vpow2.f32 %v3022_v2 }
0x2795   :  { %v3830_v60 = vpop.eup %3829 }
0x2796   :  { %2157 = vrot.lane.b32.xlu0 %v3830_v60, %s3979_s17 }
0x2797   :  { %v3832_v58 = vpop.eup %3831 }
0x2798   :  { %v2151_v48 = vadd.f32 1.0, %v3832_v58 }
0x279a   :  { %3833 = vrcp.f32 %v2151_v48 }
0x27a4   :  { %v3834_v47 = vpop.eup %3833 }
0x27a5   :  { %v2155_v5 = vmul.f32 0.0, %v3834_v47 }
0x2808   :  { %v2158_v3 = vpop.permute.xlu0 %2157 }
0x2809   :  { %v2160_v4 = vmul.f32 %v3834_v47, %v2158_v3 }
0x280b   :  { %2162 = vrot.lane.b32.xlu1 %v2160_v4, %s3980_s3 }
0x287d   :  { %v2163_v6 = vpop.permute.xlu1 %2162 }
0x287e   :  { %v2165_v50 = vadd.f32 %v2163_v6, %v2155_v5 }
0x2880   :  { %3835 = vtanh.f32 %v2165_v50 }
0x2881   :  { %3837 = vtanh.f32 %v1927_v46 }
0x2882   :  { %3839 = vpow2.f32 %v3012_v34 }
0x288a   :  { %v3836_v13 = vpop.eup %3835 }
0x288b   :  { %2168 = vrot.lane.b32.xlu0 %v3836_v13, %s3979_s17  ;;  %v3838_v61 = vpop.eup %3837  ;;  %v2050_v13 = vadd.f32 %v4464_v21, %v4507_v52 }
0x288c   :  { %v3840_v8 = vpop.eup %3839 }
0x288d   :  { %v1931_v7 = vadd.f32 1.0, %v3840_v8 }
0x288f   :  { %1937 = vrot.lane.b32.xlu0 %v3838_v61, %s3979_s17  ;;  %3841 = vrcp.f32 %v1931_v7 }
0x2899   :  { %v3842_v10 = vpop.eup %3841 }
0x289a   :  { %v1935_v59 = vmul.f32 %v3842_v10, %v4474_v36 }
0x28fd   :  { %v2169_v32 = vpop.permute.xlu0 %2168 }
0x28fe   :  { %v2171_v9 = vmul.f32 %v3834_v47, %v2169_v32 }
0x2900   :  { %2173 = vrot.lane.b32.xlu1 %v2171_v9, %s3980_s3 }
0x2901   :  { %v1938_v11 = vpop.permute.xlu0 %1937 }
0x2902   :  { %v1940_v14 = vmul.f32 %v3842_v10, %v1938_v11 }
0x2904   :  { %1942 = vrot.lane.b32.xlu0 %v1940_v14, %s3980_s3 }
0x2972   :  { %v2174_v15 = vpop.permute.xlu1 %2173 }
0x2973   :  { %3450 = vmatmul.mubr.msk.f32.vlgmr.msra.gmra.mrb[22].mxu1 %vm233_vm2, %v2174_v15 }
0x2974   :  { %3665 = vmatpush3.bf16.msra.mxu1 %v4478_v39  ;;  %3471 = vmatprep.mubr.msk.f32.mxu1 %vm3977_vm0, %v3978_v1 }
0x2975   :  { %3666 = vmatprep.subr.bf16.mxu1 %v3976_v0 }
0x2976   :  { %v1943_v16 = vpop.permute.xlu0 %1942 }
0x2977   :  { %v1945_v24 = vadd.f32 %v1943_v16, %v1935_v59 }
0x2978   :  { %3668 = vmatpush3.bf16.msra.mxu1 %v4482_v42 }
0x2979   :  { %3843 = vtanh.f32 %v1945_v24  ;;  %3675 = vmatprep.subr.bf16.mxu1 %v3976_v0 }
0x2983   :  { %v3844_v17 = vpop.eup %3843 }
0x2984   :  { %1948 = vrot.lane.b32.xlu0 %v3844_v17, %s3979_s17 }
0x29f6   :  { %v1949_v18 = vpop.permute.xlu0 %1948 }
0x29f7   :  { %v1951_v19 = vmul.f32 %v3842_v10, %v1949_v18 }
0x29f9   :  { %1964 = vrot.lane.b32.xlu0 %v1951_v19, %s3980_s3 }
0x2a46   :  { %v2243_v12 = vpop.f32.mrb[22].mxu1 }
0x2a47   :  { %v2247_v33 = vadd.f32 %v2243_v12, %v2040_v54  ;;  %v3451_v49 = vpop.f32.mrb[23].mxu1  ;;  %v2055_v54 = vadd.f32 %v4507_v52, %v4471_v26 }
0x2a49   :  { %3845 = vtanh.f32 %v2247_v33  ;;  %v3024_v28 = vmul.f32 -1.442695, %v2247_v33 }
0x2a4b   :  { %3847 = vpow2.f32 %v3024_v28 }
0x2a53   :  { %v3846_v31 = vpop.eup %3845 }
0x2a54   :  { %2257 = vrot.lane.b32.xlu1 %v3846_v31, %s3979_s17 }
0x2a55   :  { %v3848_v29 = vpop.eup %3847 }
0x2a56   :  { %v2251_v63 = vadd.f32 1.0, %v3848_v29 }
0x2a58   :  { %3849 = vrcp.f32 %v2251_v63 }
0x2a62   :  { %v3850_v22 = vpop.eup %3849 }
0x2a63   :  { %v2255_v62 = vmul.f32 %v3850_v22, %v2165_v50 }
0x2a6b   :  { %v1965_v27 = vpop.permute.xlu0 %1964 }
0x2a6c   :  { %3428 = vmatmul.mubr.msk.f32.gmra.mrb[34].mxu0 %vm233_vm2, %v1965_v27 }
0x2a6d   :  { %3460 = vmatprep.mubr.msk.f32.mxu0 %vm3977_vm0, %v3978_v1 }
0x2ac6   :  { %v2258_v20 = vpop.permute.xlu1 %2257 }
0x2ac7   :  { %v2260_v36 = vmul.f32 %v3850_v22, %v2258_v20 }
0x2ac9   :  { %2262 = vrot.lane.b32.xlu1 %v2260_v36, %s3980_s3 }
0x2b3b   :  { %v2263_v37 = vpop.permute.xlu1 %2262 }
0x2b3c   :  { %v2265_v38 = vadd.f32 %v2263_v37, %v2255_v62 }
0x2b3e   :  { %3851 = vtanh.f32 %v2265_v38 }
0x2b3f   :  { %v4533_v40 = vpop.f32.mrb[34].mxu0 }
0x2b40   :  { %v4535_v41 = vpop.f32.mrb[35].mxu0 }
0x2b48   :  { %v3852_v30 = vpop.eup %3851 }
0x2b49   :  { %2268 = vrot.lane.b32.xlu1 %v3852_v30, %s3979_s17 }
0x2bbb   :  { %v2269_v43 = vpop.permute.xlu1 %2268 }
0x2bbc   :  { %v2271_v44 = vmul.f32 %v3850_v22, %v2269_v43 }
0x2bbe   :  { %2273 = vrot.lane.b32.xlu1 %v2271_v44, %s3980_s3  ;;  %v2060_v44 = vadd.f32 %v4469_v25, %v4507_v52 }
0x2c30   :  { %v2274_v45 = vpop.permute.xlu1 %2273 }
0x2c31   :  { %3461 = vmatmul.mubr.msk.f32.vlgmr.msra.gmra.mrb[36].mxu0 %vm233_vm2, %v2274_v45 }
0x2c32   :  { %3671 = vmatpush3.bf16.msra.mxu0 %v4478_v39  ;;  %3482 = vmatprep.mubr.msk.f32.mxu0 %vm3977_vm0, %v3978_v1 }
0x2c33   :  { %3672 = vmatprep.subr.bf16.mxu0 %v3976_v0 }
0x2c36   :  { %3674 = vmatpush3.bf16.msra.mxu0 %v4482_v42 }
0x2c37   :  { %3681 = vmatprep.subr.bf16.mxu0 %v3976_v0 }
0x2d04   :  { %v2343_v46 = vpop.f32.mrb[36].mxu0 }
0x2d05   :  { %v2347_v51 = vadd.f32 %v2343_v46, %v2045_v35  ;;  %v3462_v53 = vpop.f32.mrb[37].mxu0 }
0x2d07   :  { %3853 = vtanh.f32 %v2347_v51  ;;  %v3026_v56 = vmul.f32 -1.442695, %v2347_v51 }
0x2d09   :  { %3855 = vpow2.f32 %v3026_v56 }
0x2d11   :  { %v3854_v55 = vpop.eup %3853 }
0x2d12   :  { %2357 = vrot.lane.b32.xlu0 %v3854_v55, %s3979_s17 }
0x2d13   :  { %v3856_v57 = vpop.eup %3855 }
0x2d14   :  { %v2351_v60 = vadd.f32 1.0, %v3856_v57 }
0x2d16   :  { %3857 = vrcp.f32 %v2351_v60 }
0x2d20   :  { %v3858_v2 = vpop.eup %3857 }
0x2d21   :  { %v2355_v47 = vmul.f32 %v3858_v2, %v2265_v38 }
0x2d84   :  { %v2358_v58 = vpop.permute.xlu0 %2357 }
0x2d85   :  { %v2360_v48 = vmul.f32 %v3858_v2, %v2358_v58 }
0x2d87   :  { %2362 = vrot.lane.b32.xlu1 %v2360_v48, %s3980_s3 }
0x2df9   :  { %v2363_v3 = vpop.permute.xlu1 %2362 }
0x2dfa   :  { %v2365_v23 = vadd.f32 %v2363_v3, %v2355_v47 }
0x2dfc   :  { %3859 = vtanh.f32 %v2365_v23 }
0x2e06   :  { %v3860_v4 = vpop.eup %3859 }
0x2e07   :  { %2368 = vrot.lane.b32.xlu0 %v3860_v4, %s3979_s17 }
0x2e79   :  { %v2369_v5 = vpop.permute.xlu0 %2368 }
0x2e7a   :  { %v2371_v6 = vmul.f32 %v3858_v2, %v2369_v5 }
0x2e7c   :  { %2373 = vrot.lane.b32.xlu1 %v2371_v6, %s3980_s3 }
0x2eee   :  { %v2374_v50 = vpop.permute.xlu1 %2373 }
0x2eef   :  { %3472 = vmatmul.mubr.msk.f32.vlgmr.msra.gmra.mrb[24].mxu1 %vm233_vm2, %v2374_v50 }
0x2ef0   :  { %3677 = vmatpush3.bf16.msra.mxu1 %v4478_v39  ;;  %3493 = vmatprep.mubr.msk.f32.mxu1 %vm3977_vm0, %v3978_v1 }
0x2ef1   :  { %3678 = vmatprep.subr.bf16.mxu1 %v3976_v0 }
0x2ef4   :  { %3680 = vmatpush3.bf16.msra.mxu1 %v4482_v42 }
0x2ef5   :  { %3687 = vmatprep.subr.bf16.mxu1 %v3976_v0 }
0x2fc2   :  { %v2443_v61 = vpop.f32.mrb[24].mxu1 }
0x2fc3   :  { %v2447_v34 = vadd.f32 %v2443_v61, %v2050_v13  ;;  %v3473_v8 = vpop.f32.mrb[25].mxu1 }
0x2fc5   :  { %3861 = vtanh.f32 %v2447_v34  ;;  %v3028_v32 = vmul.f32 -1.442695, %v2447_v34 }
0x2fc7   :  { %3863 = vpow2.f32 %v3028_v32 }
0x2fcf   :  { %v3862_v7 = vpop.eup %3861 }
0x2fd0   :  { %2457 = vrot.lane.b32.xlu0 %v3862_v7, %s3979_s17 }
0x2fd1   :  { %v3864_v9 = vpop.eup %3863 }
0x2fd2   :  { %v2451_v10 = vadd.f32 1.0, %v3864_v9 }
0x2fd4   :  { %3865 = vrcp.f32 %v2451_v10 }
0x2fde   :  { %v3866_v11 = vpop.eup %3865 }
0x2fdf   :  { %v2455_v59 = vmul.f32 %v3866_v11, %v2365_v23  ;;  %v2065_v23 = vadd.f32 %v4507_v52, %v4535_v41 }
0x3042   :  { %v2458_v14 = vpop.permute.xlu0 %2457 }
0x3043   :  { %v2460_v15 = vmul.f32 %v3866_v11, %v2458_v14 }
0x3045   :  { %2462 = vrot.lane.b32.xlu1 %v2460_v15, %s3980_s3 }
0x30b7   :  { %v2463_v16 = vpop.permute.xlu1 %2462 }
0x30b8   :  { %v2465_v21 = vadd.f32 %v2463_v16, %v2455_v59  ;;  %v2070_v59 = vadd.f32 %v4533_v40, %v4507_v52  ;;  %v2872_v40 = vld [vmem:[#allocation6] sm:$0xff] }
0x30ba   :  { %3867 = vtanh.f32 %v2465_v21 }
0x30c4   :  { %v3868_v24 = vpop.eup %3867 }
0x30c5   :  { %2468 = vrot.lane.b32.xlu0 %v3868_v24, %s3979_s17 }
0x3137   :  { %v2469_v17 = vpop.permute.xlu0 %2468 }
0x3138   :  { %v2471_v18 = vmul.f32 %v3866_v11, %v2469_v17 }
0x313a   :  { %2473 = vrot.lane.b32.xlu1 %v2471_v18, %s3980_s3 }
0x31ac   :  { %v2474_v19 = vpop.permute.xlu1 %2473 }
0x31ad   :  { %3483 = vmatmul.mubr.msk.f32.vlgmr.msra.gmra.mrb[38].mxu0 %vm233_vm2, %v2474_v19 }
0x31ae   :  { %3683 = vmatpush3.bf16.msra.mxu0 %v4478_v39  ;;  %3504 = vmatprep.mubr.msk.f32.mxu0 %vm3977_vm0, %v3978_v1 }
0x31af   :  { %3684 = vmatprep.subr.bf16.mxu0 %v3976_v0 }
0x31b2   :  { %3686 = vmatpush3.bf16.msra.mxu0 %v4482_v42 }
0x31b3   :  { %3693 = vmatprep.subr.bf16.mxu0 %v3976_v0 }
0x3280   :  { %v2543_v12 = vpop.f32.mrb[38].mxu0 }
0x3281   :  { %v2547_v33 = vadd.f32 %v2543_v12, %v2055_v54  ;;  %v3484_v49 = vpop.f32.mrb[39].mxu0 }
0x3283   :  { %3869 = vtanh.f32 %v2547_v33  ;;  %v3030_v27 = vmul.f32 -1.442695, %v2547_v33 }
0x3285   :  { %3871 = vpow2.f32 %v3030_v27 }
0x328d   :  { %v3870_v31 = vpop.eup %3869 }
0x328e   :  { %2557 = vrot.lane.b32.xlu0 %v3870_v31, %s3979_s17 }
0x328f   :  { %v3872_v28 = vpop.eup %3871 }
0x3290   :  { %v2551_v29 = vadd.f32 1.0, %v3872_v28  ;;  %v2873_v28 = vld [vmem:[#allocation6 + $0x8] sm:$0xff] }
0x3292   :  { %3873 = vrcp.f32 %v2551_v29  ;;  %v2874_v29 = vld [vmem:[#allocation6 + $0x10] sm:$0xff] }
0x329c   :  { %v3874_v63 = vpop.eup %3873 }
0x329d   :  { %v2555_v36 = vmul.f32 %v3874_v63, %v2465_v21 }
0x3300   :  { %v2558_v22 = vpop.permute.xlu0 %2557 }
0x3301   :  { %v2560_v20 = vmul.f32 %v3874_v63, %v2558_v22  ;;  %v2875_v22 = vld [vmem:[#allocation6 + $0x18] sm:$0xff] }
0x3303   :  { %2562 = vrot.lane.b32.xlu1 %v2560_v20, %s3980_s3  ;;  %v3697_v20 = vpack.c.bf16 %v2875_v22, %v2874_v29 }
0x3375   :  { %v2563_v62 = vpop.permute.xlu1 %2562 }
0x3376   :  { %v2565_v26 = vadd.f32 %v2563_v62, %v2555_v36 }
0x3378   :  { %3875 = vtanh.f32 %v2565_v26 }
0x3382   :  { %v3876_v37 = vpop.eup %3875 }
0x3383   :  { %2568 = vrot.lane.b32.xlu0 %v3876_v37, %s3979_s17 }
0x33f5   :  { %v2569_v38 = vpop.permute.xlu0 %2568 }
0x33f6   :  { %v2571_v30 = vmul.f32 %v3874_v63, %v2569_v38  ;;  %v3694_v63 = vpack.c.bf16 %v2873_v28, %v2872_v40  ;;  %v3037_v38 = vld [vmem:[%s4625_s11] ss:$0 sm:$0xff] }
0x33f8   :  { %2573 = vrot.lane.b32.xlu1 %v2571_v30, %s3980_s3 }
0x346a   :  { %v2574_v43 = vpop.permute.xlu1 %2573 }
0x346b   :  { %3494 = vmatmul.mubr.msk.f32.vlgmr.msra.gmra.mrb[26].mxu1 %vm233_vm2, %v2574_v43 }
0x346c   :  { %3689 = vmatpush3.bf16.msra.mxu1 %v4478_v39  ;;  %3515 = vmatprep.mubr.msk.f32.mxu1 %vm3977_vm0, %v3978_v1 }
0x346d   :  { %3690 = vmatprep.subr.bf16.mxu1 %v3976_v0 }
0x3470   :  { %3692 = vmatpush3.bf16.msra.mxu1 %v4482_v42 }
0x353e   :  { %v2643_v45 = vpop.f32.mrb[26].mxu1 }
0x353f   :  { %v2647_v35 = vadd.f32 %v2643_v45, %v2060_v44  ;;  %v3495_v46 = vpop.f32.mrb[27].mxu1 }
0x3541   :  { %3877 = vtanh.f32 %v2647_v35  ;;  %v3032_v53 = vmul.f32 -1.442695, %v2647_v35 }
0x3543   :  { %3879 = vpow2.f32 %v3032_v53 }
0x354b   :  { %v3878_v51 = vpop.eup %3877 }
0x354c   :  { %2657 = vrot.lane.b32.xlu0 %v3878_v51, %s3979_s17 }
0x354d   :  { %v3880_v39 = vpop.eup %3879 }
0x354e   :  { %v2651_v55 = vadd.f32 1.0, %v3880_v39 }
0x3550   :  { %3881 = vrcp.f32 %v2651_v55 }
0x355a   :  { %v3882_v56 = vpop.eup %3881 }
0x355b   :  { %v2655_v42 = vmul.f32 %v3882_v56, %v2565_v26 }
0x35be   :  { %v2658_v57 = vpop.permute.xlu0 %2657 }
0x35bf   :  { %v2660_v60 = vmul.f32 %v3882_v56, %v2658_v57 }
0x35c1   :  { %2662 = vrot.lane.b32.xlu1 %v2660_v60, %s3980_s3 }
0x3633   :  { %v2663_v2 = vpop.permute.xlu1 %2662 }
0x3634   :  { %v2665_v25 = vadd.f32 %v2663_v2, %v2655_v42 }
0x3636   :  { %3883 = vtanh.f32 %v2665_v25 }
0x3640   :  { %v3884_v58 = vpop.eup %3883 }
0x3641   :  { %2668 = vrot.lane.b32.xlu0 %v3884_v58, %s3979_s17 }
0x36b3   :  { %v2669_v48 = vpop.permute.xlu0 %2668 }
0x36b4   :  { %v2671_v47 = vmul.f32 %v3882_v56, %v2669_v48 }
0x36b6   :  { %2673 = vrot.lane.b32.xlu1 %v2671_v47, %s3980_s3 }
0x3728   :  { %v2674_v3 = vpop.permute.xlu1 %2673 }
0x3729   :  { %3505 = vmatmul.mubr.msk.f32.vlgmr.msra.gmra.mrb[40].mxu0 %vm233_vm2, %v2674_v3 }
0x372a   :  { %3526 = vmatprep.mubr.msk.f32.mxu0 %vm3977_vm0, %v3978_v1  ;;  %3695 = vmatpush3.bf16.msra.mxu0 %v3694_v63 }
0x372b   :  { %3696 = vmatprep.subr.bf16.mxu0 %v3976_v0 }
0x372e   :  { %3698 = vmatpush3.bf16.msra.mxu0 %v3697_v20 }
0x37fc   :  { %v2743_v4 = vpop.f32.mrb[40].mxu0 }
0x37fd   :  { %v2747_v5 = vadd.f32 %v2743_v4, %v2065_v23  ;;  %v3506_v6 = vpop.f32.mrb[41].mxu0 }
0x37ff   :  { %3885 = vtanh.f32 %v2747_v5  ;;  %v3034_v13 = vmul.f32 -1.442695, %v2747_v5 }
0x3801   :  { %3887 = vpow2.f32 %v3034_v13 }
0x3809   :  { %v3886_v50 = vpop.eup %3885 }
0x380a   :  { %2757 = vrot.lane.b32.xlu0 %v3886_v50, %s3979_s17 }
0x380b   :  { %v3888_v61 = vpop.eup %3887 }
0x380c   :  { %v2751_v34 = vadd.f32 1.0, %v3888_v61 }
0x380e   :  { %3889 = vrcp.f32 %v2751_v34 }
0x3818   :  { %v3890_v8 = vpop.eup %3889 }
0x3819   :  { %v2755_v1 = vmul.f32 %v3890_v8, %v2665_v25 }
0x387c   :  { %v2758_v7 = vpop.permute.xlu0 %2757 }
0x387d   :  { %v2760_v32 = vmul.f32 %v3890_v8, %v2758_v7 }
0x387f   :  { %2762 = vrot.lane.b32.xlu1 %v2760_v32, %s3980_s3 }
0x38f1   :  { %v2763_v9 = vpop.permute.xlu1 %2762 }
0x38f2   :  { %v2765_v41 = vadd.f32 %v2763_v9, %v2755_v1 }
0x38f4   :  { %3891 = vtanh.f32 %v2765_v41 }
0x38fe   :  { %v3892_v10 = vpop.eup %3891 }
0x38ff   :  { %2768 = vrot.lane.b32.xlu0 %v3892_v10, %s3979_s17 }
0x3971   :  { %v2769_v11 = vpop.permute.xlu0 %2768 }
0x3972   :  { %v2771_v14 = vmul.f32 %v3890_v8, %v2769_v11 }
0x3974   :  { %2773 = vrot.lane.b32.xlu1 %v2771_v14, %s3980_s3 }
0x39e6   :  { %v2774_v15 = vpop.permute.xlu1 %2773 }
0x39e7   :  { %3516 = vmatmul.mubr.msk.f32.vlgmr.msra.gmra.mrb[28].mxu1 %vm233_vm2, %v2774_v15 }
0x3aba   :  { %v2843_v16 = vpop.f32.mrb[28].mxu1 }
0x3abb   :  { %v2847_v21 = vadd.f32 %v2843_v16, %v2070_v59  ;;  %v3517_v24 = vpop.f32.mrb[29].mxu1 }
0x3abd   :  { %3893 = vtanh.f32 %v2847_v21  ;;  %v3036_v18 = vmul.f32 -1.442695, %v2847_v21 }
0x3abf   :  { %3895 = vpow2.f32 %v3036_v18 }
0x3ac7   :  { %v3894_v17 = vpop.eup %3893 }
0x3ac8   :  { %2857 = vrot.lane.b32.xlu0 %v3894_v17, %s3979_s17 }
0x3ac9   :  { %v3896_v19 = vpop.eup %3895 }
0x3aca   :  { %v2851_v54 = vadd.f32 1.0, %v3896_v19 }
0x3acc   :  { %3897 = vrcp.f32 %v2851_v54 }
0x3ad6   :  { %v3898_v12 = vpop.eup %3897 }
0x3ad7   :  { %v2855_v31 = vmul.f32 %v3898_v12, %v2765_v41 }
0x3b3a   :  { %v2858_v33 = vpop.permute.xlu0 %2857 }
0x3b3b   :  { %v2860_v49 = vmul.f32 %v3898_v12, %v2858_v33 }
0x3b3d   :  { %2862 = vrot.lane.b32.xlu1 %v2860_v49, %s3980_s3 }
0x3baf   :  { %v2863_v27 = vpop.permute.xlu1 %2862 }
0x3bb0   :  { %v2865_v52 = vadd.f32 %v2863_v27, %v2855_v31 }
0x3bb2   :  { %3899 = vtanh.f32 %v2865_v52 }
0x3bbc   :  { %v3900_v36 = vpop.eup %3899 }
0x3bbd   :  { %2868 = vrot.lane.b32.xlu0 %v3900_v36, %s3979_s17 }
0x3c2f   :  { %v2869_v62 = vpop.permute.xlu0 %2868 }
0x3c30   :  { %v2871_v26 = vmul.f32 %v3898_v12, %v2869_v62 }
0x3c32   :  { %2884 = vrot.lane.b32.xlu1 %v2871_v26, %s3980_s3 }
0x3ca4   :  { %v2885_v37 = vpop.permute.xlu1 %2884 }
0x3ca5   :  { %3527 = vmatmul.mubr.msk.f32.vlgmr.msra.gmra.mrb[42].mxu0 %vm233_vm2, %v2885_v37 }
0x3d78   :  { %v2954_v30 = vpop.f32.mrb[42].mxu0 }
0x3d79   :  { %v2955_v43 = vadd.f32 %v3037_v38, %v2954_v30  ;;  %v3528_v44 = vpop.f32.mrb[43].mxu0 }
0x3d7b   :  { %2958 = vst [vmem:[%s4626_s12] sm:$0xff] %v2955_v43 }
0x3d7c   :  { %2963 = vsyncpa [#allocation3], 1 }
0x3d7d   :  { %2964 = vsyncpa [#allocation5], 1 }

</bundles_post_ra>
